<compile_context>
chip_gen: v7x
topology: tpu7x:2x2x1
jax: 0.10.0
libtpu: 0.0.40
codegen_flags: <defaults>
</compile_context>

<pallas_src>
import functools
import math

import jax
import jax.numpy as jnp
from jax import lax
from jax.experimental import pallas as pl
from jax.experimental.pallas import tpu as pltpu  # noqa: F401  (kept for TPU-specific params if needed)


CFG = dict(
    n_enc_vocab=32,
    n_enc_seq=8,
    n_seg_type=2,
    d_embd=16,
    d_hidn=32,
    n_head=4,
    d_head=8,
    d_ff=64,
    n_layer=2,
    n_output=2,
    i_pad=0,
    dropout=0.1,                # identity here (eval mode)
    layer_norm_epsilon=1e-12,
)


# ----------------------------- small math helpers -----------------------------
def _erf(x):
    # Abramowitz & Stegun 7.1.26 rational approximation (max abs err ~1.5e-7),
    # matching PyTorch's exact (erf-based) F.gelu to float32 precision without
    # relying on an erf primitive inside Mosaic.
    a1, a2, a3, a4, a5 = 0.254829592, -0.284496736, 1.421413741, -1.453152027, 1.061405429
    p = 0.3275911
    sgn = jnp.where(x < 0.0, -1.0, 1.0)
    ax = jnp.abs(x)
    t = 1.0 / (1.0 + p * ax)
    poly = t * (a1 + t * (a2 + t * (a3 + t * (a4 + t * a5))))
    return sgn * (1.0 - poly * jnp.exp(-ax * ax))


def _gelu(x):
    # PyTorch F.gelu default: 0.5 * x * (1 + erf(x / sqrt(2)))
    return 0.5 * x * (1.0 + _erf(x * (1.0 / math.sqrt(2.0))))


def _layernorm(x, g, b, eps):
    mu = jnp.mean(x, axis=-1, keepdims=True)
    var = jnp.mean(jnp.square(x - mu), axis=-1, keepdims=True)
    return (x - mu) * lax.rsqrt(var + eps) * g + b


# ----------------------------- fused ALBERT kernel -----------------------------
def albert_fused_kernel(xf_ref, maskb_ref,
                        wqkv_ref, bqkv_ref, wo_ref,
                        wc1_ref, bc1_ref, wc2_ref,
                        vech_ref, wpool_ref, wproj_ref,
                        logits_ref, attn_ref,
                        *, batch, seq, n_layer, n_head, d_head, eps):
    BS, H = xf_ref.shape                       # folded (batch*seq, hidden)
    NHD = n_head * d_head
    DFF = wc1_ref.shape[-1]

    # ---- hoisted weight loads & broadcasts (loop-invariant, done once) ----
    wqkv = wqkv_ref[...]                       # (H, 3*NHD), 1/sqrt(d_head) folded into Q cols
    wo = wo_ref[...]                           # (NHD, H)
    wc1 = wc1_ref[...]                         # (H, DFF)
    wc2 = wc2_ref[...]                         # (DFF, H)
    vech = vech_ref[...]                       # (8, H) packed small vectors
    bqkv_b = jnp.broadcast_to(bqkv_ref[...], (BS, 3 * NHD))
    bc1_b = jnp.broadcast_to(bc1_ref[...], (BS, DFF))
    bo_b = jnp.broadcast_to(vech[0:1, :], (BS, H))
    ln1g_b = jnp.broadcast_to(vech[1:2, :], (BS, H))
    ln1b_b = jnp.broadcast_to(vech[2:3, :], (BS, H))
    bc2_b = jnp.broadcast_to(vech[3:4, :], (BS, H))
    ln2g_b = jnp.broadcast_to(vech[4:5, :], (BS, H))
    ln2b_b = jnp.broadcast_to(vech[5:6, :], (BS, H))
    bpool = vech[6:7, :]                       # (1, H)
    # additive attention bias (-1e9 on PAD keys and cross-batch pairs), broadcast once.
    mask_b = jnp.broadcast_to(maskb_ref[...][None], (n_head, BS, BS))

    x = xf_ref[...]                            # (BS, H)

    # ALBERT: the SAME shared-weight layer applied n_layer times; activations stay on-chip.
    for li in range(n_layer):
        # One packed QKV projection for all heads and the whole folded batch.
        qkv = jnp.dot(x, wqkv, preferred_element_type=jnp.float32) + bqkv_b   # (BS, 3*NHD)

        def split_heads(off):
            # (BS, NHD) lane slab -> (NH, BS, DH) via static lane slices + leading stack.
            return jnp.stack(
                [qkv[:, off + n * d_head: off + (n + 1) * d_head] for n in range(n_head)],
                axis=0)

        qh = split_heads(0)                    # (NH, BS, DH)
        kh = split_heads(NHD)
        vh = split_heads(2 * NHD)

        # Block-diagonal scaled dot-product attention over the folded batch axis.
        # Scale already folded into wq/bq.  Cross-batch / PAD-key scores get -1e9
        # (-> exp underflows to exactly 0, matching masked softmax).
        s = jnp.einsum('nqd,nkd->nqk', qh, kh,
                       preferred_element_type=jnp.float32) + mask_b           # (NH, BS, BS)
        s = s - jnp.max(s, axis=-1, keepdims=True)
        e = jnp.exp(s)
        prob = e * pl.reciprocal(jnp.sum(e, axis=-1, keepdims=True), approx=True)
        # One store per layer covering all heads / all (folded) batch rows.
        attn_ref[li, :, :, :] = prob

        ctx = jnp.einsum('nqk,nkd->nqd', prob, vh,
                         preferred_element_type=jnp.float32)                  # (NH, BS, DH)
        # Merge heads back to (BS, NHD) and apply the packed output projection once.
        ctx_m = jnp.concatenate([ctx[n] for n in range(n_head)], axis=-1)
        att = jnp.dot(ctx_m, wo, preferred_element_type=jnp.float32) + bo_b
        y = _layernorm(x + att, ln1g_b, ln1b_b, eps)                          # layer_norm1

        # Position-wise FFN (Conv1d k=1 == matmul along hidden)
        h1 = _gelu(jnp.dot(y, wc1, preferred_element_type=jnp.float32) + bc1_b)
        h2 = jnp.dot(h1, wc2, preferred_element_type=jnp.float32) + bc2_b
        x = _layernorm(h2 + y, ln2g_b, ln2b_b, eps)                           # layer_norm2

    # Pooled output (tanh(linear)) + bias-free classifier on each sequence's CLS row.
    cls = jnp.concatenate([x[b * seq: b * seq + 1, :] for b in range(batch)], axis=0)  # (B, H)
    pooled = jnp.tanh(
        jnp.dot(cls, wpool_ref[...], preferred_element_type=jnp.float32) + bpool)
    logits_ref[...] = jnp.dot(pooled, wproj_ref[...], preferred_element_type=jnp.float32)


# ----------------------------- parameter init (deterministic, synthetic) -----------------------------
def init_params(cfg, key):
    H, E = cfg['d_hidn'], cfg['d_embd']
    NH, DH, DFF = cfg['n_head'], cfg['d_head'], cfg['d_ff']

    def nrm(k, shape):
        return 0.02 * jax.random.normal(k, shape, jnp.float32)

    keys = jax.random.split(key, 20)
    # NOTE: linear weights are stored in math layout [in_dim, out_dim]
    # (i.e. transposed relative to PyTorch's nn.Linear.weight).
    return dict(
        enc_emb=nrm(keys[0], (cfg['n_enc_vocab'], E)),
        w_factor=nrm(keys[1], (E, H)),                         # factorize (no bias)
        pos_emb=nrm(keys[2], (cfg['n_enc_seq'] + 1, H)),
        seg_emb=nrm(keys[3], (cfg['n_seg_type'], H)),
        wq=nrm(keys[4], (H, NH * DH)), bq=nrm(keys[5], (1, NH * DH)),
        wk=nrm(keys[6], (H, NH * DH)), bk=nrm(keys[7], (1, NH * DH)),
        wv=nrm(keys[8], (H, NH * DH)), bv=nrm(keys[9], (1, NH * DH)),
        wo=nrm(keys[10], (NH * DH, H)), bo=nrm(keys[11], (1, H)),
        ln1_g=jnp.ones((1, H), jnp.float32), ln1_b=jnp.zeros((1, H), jnp.float32),
        wc1=nrm(keys[12], (H, DFF)), bc1=nrm(keys[13], (1, DFF)),
        wc2=nrm(keys[14], (DFF, H)), bc2=nrm(keys[15], (1, H)),
        ln2_g=jnp.ones((1, H), jnp.float32), ln2_b=jnp.zeros((1, H), jnp.float32),
        w_pool=nrm(keys[16], (H, H)), b_pool=nrm(keys[17], (1, H)),
        w_proj=nrm(keys[18], (H, cfg['n_output'])),            # projection_cls (no bias)
    )


# ----------------------------- full forward (ALBertTrainMovie.forward) -----------------------------
def albert_train_movie_forward(inputs, segments, params, cfg):
    B, S = inputs.shape
    H, NH, DH, NL = cfg['d_hidn'], cfg['n_head'], cfg['d_head'], cfg['n_layer']
    n_out = cfg['n_output']
    NHD = NH * DH
    BS = B * S

    # --- embedding glue (data-dependent gathers, plain JAX prologue) ---
    positions = jnp.broadcast_to(jnp.arange(S, dtype=inputs.dtype) + 1, (B, S))
    positions = jnp.where(inputs == cfg['i_pad'], 0, positions)
    x = (jnp.take(params['enc_emb'], inputs, axis=0) @ params['w_factor']
         + jnp.take(params['pos_emb'], positions, axis=0)
         + jnp.take(params['seg_emb'], segments, axis=0)).astype(jnp.float32)
    xf = x.reshape(BS, H)                                   # fold batch into sequence axis

    # Additive attention-bias matrix over the folded axis: -1e9 where the key is PAD
    # or belongs to a different batch element (block-diagonal attention), 0 elsewhere.
    key_pad = (inputs == cfg['i_pad']).reshape(BS)
    bids = jnp.arange(BS) // S
    allowed = (bids[:, None] == bids[None, :]) & (~key_pad)[None, :]
    mask_add = jnp.where(allowed, 0.0, -1.0e9).astype(jnp.float32)   # (BS, BS)

    # --- one-time host-side weight transforms (parameter transforms, not input scaling) ---
    scale = 1.0 / math.sqrt(DH)
    wqkv = jnp.concatenate([params['wq'] * scale, params['wk'], params['wv']], axis=1)  # (H, 3*NHD)
    bqkv = jnp.concatenate([params['bq'] * scale, params['bk'], params['bv']], axis=1)  # (1, 3*NHD)
    vech = jnp.concatenate([params['bo'], params['ln1_g'], params['ln1_b'],
                            params['bc2'], params['ln2_g'], params['ln2_b'],
                            params['b_pool'], jnp.zeros((1, H), jnp.float32)], axis=0)  # (8, H)

    kern = functools.partial(
        albert_fused_kernel,
        batch=B, seq=S, n_layer=NL, n_head=NH, d_head=DH,
        eps=cfg['layer_norm_epsilon'],
    )

    # Single kernel invocation (no grid): everything fits comfortably in VMEM and the
    # per-grid-step overhead / weight re-staging is avoided entirely.
    logits, attn_full = pl.pallas_call(
        kern,
        out_shape=(jax.ShapeDtypeStruct((B, n_out), jnp.float32),
                   jax.ShapeDtypeStruct((NL, NH, BS, BS), jnp.float32)),
    )(xf, mask_add, wqkv, bqkv, params['wo'], params['wc1'], params['bc1'],
      params['wc2'], vech, params['w_pool'], params['w_proj'])

    # Extract the per-batch diagonal blocks of the block-diagonal attention matrix.
    attn6 = attn_full.reshape(NL, NH, B, S, B, S)
    attn_probs = [jnp.stack([attn6[l, :, b, :, b, :] for b in range(B)], axis=0)
                  for l in range(NL)]                       # each (B, NH, S, S)
    return logits, attn_probs


# ----------------------------- pure-JAX reference (for sanity check) -----------------------------
def _ref_layer(x, mask3, p, cfg):
    B, S, H = x.shape
    NH, DH = cfg['n_head'], cfg['d_head']
    q = x @ p['wq'] + p['bq']
    k = x @ p['wk'] + p['bk']
    v = x @ p['wv'] + p['bv']

    def heads(t):
        return t.reshape(B, S, NH, DH).transpose(0, 2, 1, 3)

    qh, kh, vh = heads(q), heads(k), heads(v)
    s = jnp.einsum('bhqd,bhkd->bhqk', qh, kh) / math.sqrt(DH)
    s = jnp.where(mask3[:, None, :, :] > 0.5, -1.0e9, s)
    prob = jax.nn.softmax(s, axis=-1)
    ctx = jnp.einsum('bhqk,bhkd->bhqd', prob, vh).transpose(0, 2, 1, 3).reshape(B, S, NH * DH)
    att = ctx @ p['wo'] + p['bo']
    y = _layernorm(x + att, p['ln1_g'], p['ln1_b'], cfg['layer_norm_epsilon'])
    h1 = _gelu(y @ p['wc1'] + p['bc1'])
    h2 = h1 @ p['wc2'] + p['bc2']
    return _layernorm(h2 + y, p['ln2_g'], p['ln2_b'], cfg['layer_norm_epsilon']), prob


def albert_reference(inputs, segments, p, cfg):
    B, S = inputs.shape
    positions = jnp.broadcast_to(jnp.arange(S, dtype=inputs.dtype) + 1, (B, S))
    positions = jnp.where(inputs == cfg['i_pad'], 0, positions)
    x = (jnp.take(p['enc_emb'], inputs, axis=0) @ p['w_factor']
         + jnp.take(p['pos_emb'], positions, axis=0)
         + jnp.take(p['seg_emb'], segments, axis=0)).astype(jnp.float32)
    pad_k = (inputs == cfg['i_pad']).astype(jnp.float32)
    mask3 = jnp.broadcast_to(pad_k[:, None, :], (B, S, S))
    attn_probs = []
    for _ in range(cfg['n_layer']):
        x, prob = _ref_layer(x, mask3, p, cfg)
        attn_probs.append(prob)
    pooled = jnp.tanh(x[:, 0, :] @ p['w_pool'] + p['b_pool'])
    return pooled @ p['w_proj'], attn_probs


# ----------------------------- main -----------------------------
if __name__ == "__main__":
    cfg = CFG
    key = jax.random.PRNGKey(0)
    kp, ki = jax.random.split(key, 2)
    params = init_params(cfg, kp)

    B, S = 2, cfg['n_enc_seq']
    inputs = jax.random.randint(ki, (B, S), 0, cfg['n_enc_vocab'], dtype=jnp.int32)
    inputs = inputs.at[:, 0].set(1)                 # keep CLS-like slot non-pad
    inputs = inputs.at[:, -2:].set(cfg['i_pad'])    # force PAD tokens to exercise the mask
    segments = jnp.zeros((B, S), dtype=jnp.int32).at[:, S // 2:].set(1)

    logits_cls, attn_probs = albert_train_movie_forward(inputs, segments, params, cfg)
    logits_cls = jax.block_until_ready(logits_cls)

    assert logits_cls.shape == (B, cfg['n_output'])
    assert len(attn_probs) == cfg['n_layer']
    assert all(a.shape == (B, cfg['n_head'], S, S) for a in attn_probs)

    ref_logits, ref_attn = albert_reference(inputs, segments, params, cfg)
    if not jnp.allclose(logits_cls, ref_logits, atol=1e-2, rtol=1e-2):
        raise AssertionError(f"kernel/reference logits mismatch:\n{logits_cls}\nvs\n{ref_logits}")
    for a, r in zip(attn_probs, ref_attn):
        if not jnp.allclose(a, r, atol=1e-2, rtol=1e-2):
            raise AssertionError("kernel/reference attention-prob mismatch")

    print("KERNEL_OK")
</pallas_src>

<mosaic_0001>
module attributes {stable_mosaic.version = 11 : i64} {
  func.func @albert_fused_kernel(%arg0: memref<16x32xf32, #tpu.memory_space<vmem>>, %arg1: memref<16x16xf32, #tpu.memory_space<vmem>>, %arg2: memref<32x96xf32, #tpu.memory_space<vmem>>, %arg3: memref<1x96xf32, #tpu.memory_space<vmem>>, %arg4: memref<32x32xf32, #tpu.memory_space<vmem>>, %arg5: memref<32x64xf32, #tpu.memory_space<vmem>>, %arg6: memref<1x64xf32, #tpu.memory_space<vmem>>, %arg7: memref<64x32xf32, #tpu.memory_space<vmem>>, %arg8: memref<8x32xf32, #tpu.memory_space<vmem>>, %arg9: memref<32x32xf32, #tpu.memory_space<vmem>>, %arg10: memref<32x2xf32, #tpu.memory_space<vmem>>, %arg11: memref<2x2xf32, #tpu.memory_space<vmem>>, %arg12: memref<2x4x16x16xf32, #tpu.memory_space<vmem>>) attributes {dimension_semantics = [], scalar_prefetch = 0 : i64, scratch_operands = 0 : i64, tpu.core_type = #tpu.core_type<tc>} {
    %c0 = arith.constant 0 : index
    %c0_0 = arith.constant 0 : index
    %0 = vector.load %arg2[%c0, %c0_0] : memref<32x96xf32, #tpu.memory_space<vmem>>, vector<32x96xf32>
    %c0_1 = arith.constant 0 : index
    %c0_2 = arith.constant 0 : index
    %1 = vector.load %arg4[%c0_1, %c0_2] : memref<32x32xf32, #tpu.memory_space<vmem>>, vector<32x32xf32>
    %c0_3 = arith.constant 0 : index
    %c0_4 = arith.constant 0 : index
    %2 = vector.load %arg5[%c0_3, %c0_4] : memref<32x64xf32, #tpu.memory_space<vmem>>, vector<32x64xf32>
    %c0_5 = arith.constant 0 : index
    %c0_6 = arith.constant 0 : index
    %3 = vector.load %arg7[%c0_5, %c0_6] : memref<64x32xf32, #tpu.memory_space<vmem>>, vector<64x32xf32>
    %c0_7 = arith.constant 0 : index
    %c0_8 = arith.constant 0 : index
    %4 = vector.load %arg8[%c0_7, %c0_8] : memref<8x32xf32, #tpu.memory_space<vmem>>, vector<8x32xf32>
    %c0_9 = arith.constant 0 : index
    %c0_10 = arith.constant 0 : index
    %5 = vector.load %arg3[%c0_9, %c0_10] : memref<1x96xf32, #tpu.memory_space<vmem>>, vector<1x96xf32>
    %6 = vector.shape_cast %5 : vector<1x96xf32> to vector<1x96xf32>
    %7 = vector.broadcast %6 : vector<1x96xf32> to vector<16x96xf32>
    %c0_11 = arith.constant 0 : index
    %c0_12 = arith.constant 0 : index
    %8 = vector.load %arg6[%c0_11, %c0_12] : memref<1x64xf32, #tpu.memory_space<vmem>>, vector<1x64xf32>
    %9 = vector.shape_cast %8 : vector<1x64xf32> to vector<1x64xf32>
    %10 = vector.broadcast %9 : vector<1x64xf32> to vector<16x64xf32>
    %11 = vector.extract_strided_slice %4 {offsets = [0, 0], sizes = [1, 32], strides = [1, 1]} : vector<8x32xf32> to vector<1x32xf32>
    %12 = vector.shape_cast %11 : vector<1x32xf32> to vector<1x32xf32>
    %13 = vector.broadcast %12 : vector<1x32xf32> to vector<16x32xf32>
    %14 = vector.extract_strided_slice %4 {offsets = [1, 0], sizes = [1, 32], strides = [1, 1]} : vector<8x32xf32> to vector<1x32xf32>
    %15 = vector.shape_cast %14 : vector<1x32xf32> to vector<1x32xf32>
    %16 = vector.broadcast %15 : vector<1x32xf32> to vector<16x32xf32>
    %17 = vector.extract_strided_slice %4 {offsets = [2, 0], sizes = [1, 32], strides = [1, 1]} : vector<8x32xf32> to vector<1x32xf32>
    %18 = vector.shape_cast %17 : vector<1x32xf32> to vector<1x32xf32>
    %19 = vector.broadcast %18 : vector<1x32xf32> to vector<16x32xf32>
    %20 = vector.extract_strided_slice %4 {offsets = [3, 0], sizes = [1, 32], strides = [1, 1]} : vector<8x32xf32> to vector<1x32xf32>
    %21 = vector.shape_cast %20 : vector<1x32xf32> to vector<1x32xf32>
    %22 = vector.broadcast %21 : vector<1x32xf32> to vector<16x32xf32>
    %23 = vector.extract_strided_slice %4 {offsets = [4, 0], sizes = [1, 32], strides = [1, 1]} : vector<8x32xf32> to vector<1x32xf32>
    %24 = vector.shape_cast %23 : vector<1x32xf32> to vector<1x32xf32>
    %25 = vector.broadcast %24 : vector<1x32xf32> to vector<16x32xf32>
    %26 = vector.extract_strided_slice %4 {offsets = [5, 0], sizes = [1, 32], strides = [1, 1]} : vector<8x32xf32> to vector<1x32xf32>
    %27 = vector.shape_cast %26 : vector<1x32xf32> to vector<1x32xf32>
    %28 = vector.broadcast %27 : vector<1x32xf32> to vector<16x32xf32>
    %29 = vector.extract_strided_slice %4 {offsets = [6, 0], sizes = [1, 32], strides = [1, 1]} : vector<8x32xf32> to vector<1x32xf32>
    %c0_13 = arith.constant 0 : index
    %c0_14 = arith.constant 0 : index
    %30 = vector.load %arg1[%c0_13, %c0_14] : memref<16x16xf32, #tpu.memory_space<vmem>>, vector<16x16xf32>
    %31 = vector.shape_cast %30 : vector<16x16xf32> to vector<1x16x16xf32>
    %32 = vector.shape_cast %31 : vector<1x16x16xf32> to vector<1x16x16xf32>
    %33 = vector.broadcast %32 : vector<1x16x16xf32> to vector<4x16x16xf32>
    %c0_15 = arith.constant 0 : index
    %c0_16 = arith.constant 0 : index
    %34 = vector.load %arg0[%c0_15, %c0_16] : memref<16x32xf32, #tpu.memory_space<vmem>>, vector<16x32xf32>
    %cst = arith.constant dense<0.000000e+00> : vector<16x96xf32>
    %35 = tpu.matmul %34, %0, %cst {dimension_numbers = #tpu.dot_dimension_numbers<[1], [0], [0], [1], [0, 0, 1, 1], [], []>} : vector<16x32xf32>, vector<32x96xf32>, vector<16x96xf32> -> vector<16x96xf32>
    %36 = arith.addf %35, %7 : vector<16x96xf32>
    %37 = vector.extract_strided_slice %36 {offsets = [0, 0], sizes = [16, 8], strides = [1, 1]} : vector<16x96xf32> to vector<16x8xf32>
    %38 = vector.extract_strided_slice %36 {offsets = [0, 8], sizes = [16, 8], strides = [1, 1]} : vector<16x96xf32> to vector<16x8xf32>
    %39 = vector.extract_strided_slice %36 {offsets = [0, 16], sizes = [16, 8], strides = [1, 1]} : vector<16x96xf32> to vector<16x8xf32>
    %40 = vector.extract_strided_slice %36 {offsets = [0, 24], sizes = [16, 8], strides = [1, 1]} : vector<16x96xf32> to vector<16x8xf32>
    %41 = vector.shape_cast %37 : vector<16x8xf32> to vector<1x16x8xf32>
    %42 = vector.shape_cast %38 : vector<16x8xf32> to vector<1x16x8xf32>
    %43 = vector.shape_cast %39 : vector<16x8xf32> to vector<1x16x8xf32>
    %44 = vector.shape_cast %40 : vector<16x8xf32> to vector<1x16x8xf32>
    %45 = tpu.concatenate %41, %42, %43, %44 in 0 : vector<1x16x8xf32>, vector<1x16x8xf32>, vector<1x16x8xf32>, vector<1x16x8xf32> -> vector<4x16x8xf32>
    %46 = vector.extract_strided_slice %36 {offsets = [0, 32], sizes = [16, 8], strides = [1, 1]} : vector<16x96xf32> to vector<16x8xf32>
    %47 = vector.extract_strided_slice %36 {offsets = [0, 40], sizes = [16, 8], strides = [1, 1]} : vector<16x96xf32> to vector<16x8xf32>
    %48 = vector.extract_strided_slice %36 {offsets = [0, 48], sizes = [16, 8], strides = [1, 1]} : vector<16x96xf32> to vector<16x8xf32>
    %49 = vector.extract_strided_slice %36 {offsets = [0, 56], sizes = [16, 8], strides = [1, 1]} : vector<16x96xf32> to vector<16x8xf32>
    %50 = vector.shape_cast %46 : vector<16x8xf32> to vector<1x16x8xf32>
    %51 = vector.shape_cast %47 : vector<16x8xf32> to vector<1x16x8xf32>
    %52 = vector.shape_cast %48 : vector<16x8xf32> to vector<1x16x8xf32>
    %53 = vector.shape_cast %49 : vector<16x8xf32> to vector<1x16x8xf32>
    %54 = tpu.concatenate %50, %51, %52, %53 in 0 : vector<1x16x8xf32>, vector<1x16x8xf32>, vector<1x16x8xf32>, vector<1x16x8xf32> -> vector<4x16x8xf32>
    %55 = vector.extract_strided_slice %36 {offsets = [0, 64], sizes = [16, 8], strides = [1, 1]} : vector<16x96xf32> to vector<16x8xf32>
    %56 = vector.extract_strided_slice %36 {offsets = [0, 72], sizes = [16, 8], strides = [1, 1]} : vector<16x96xf32> to vector<16x8xf32>
    %57 = vector.extract_strided_slice %36 {offsets = [0, 80], sizes = [16, 8], strides = [1, 1]} : vector<16x96xf32> to vector<16x8xf32>
    %58 = vector.extract_strided_slice %36 {offsets = [0, 88], sizes = [16, 8], strides = [1, 1]} : vector<16x96xf32> to vector<16x8xf32>
    %59 = vector.shape_cast %55 : vector<16x8xf32> to vector<1x16x8xf32>
    %60 = vector.shape_cast %56 : vector<16x8xf32> to vector<1x16x8xf32>
    %61 = vector.shape_cast %57 : vector<16x8xf32> to vector<1x16x8xf32>
    %62 = vector.shape_cast %58 : vector<16x8xf32> to vector<1x16x8xf32>
    %63 = tpu.concatenate %59, %60, %61, %62 in 0 : vector<1x16x8xf32>, vector<1x16x8xf32>, vector<1x16x8xf32>, vector<1x16x8xf32> -> vector<4x16x8xf32>
    "tpu.trace_start"() <{level = 10 : i32, message = "nqd,nkd->nqk"}> : () -> ()
    %cst_17 = arith.constant dense<0.000000e+00> : vector<4x16x16xf32>
    %64 = tpu.matmul %45, %54, %cst_17 {dimension_numbers = #tpu.dot_dimension_numbers<[2], [2], [1], [1], [0, 0, 0, 1, 1, 1], [0], [0]>} : vector<4x16x8xf32>, vector<4x16x8xf32>, vector<4x16x16xf32> -> vector<4x16x16xf32>
    "tpu.trace_stop"() : () -> ()
    %65 = arith.addf %64, %33 : vector<4x16x16xf32>
    %cst_18 = arith.constant dense<0xFF800000> : vector<4x16xf32>
    %66 = vector.multi_reduction <maximumf>, %65, %cst_18 [2] : vector<4x16x16xf32> to vector<4x16xf32>
    %67 = vector.shape_cast %66 : vector<4x16xf32> to vector<4x16x1xf32>
    %68 = vector.broadcast %67 : vector<4x16x1xf32> to vector<4x16x16xf32>
    %69 = arith.subf %65, %68 : vector<4x16x16xf32>
    %70 = math.exp %69 : vector<4x16x16xf32>
    %cst_19 = arith.constant dense<0.000000e+00> : vector<4x16xf32>
    %71 = vector.multi_reduction <add>, %70, %cst_19 [2] : vector<4x16x16xf32> to vector<4x16xf32>
    %72 = vector.shape_cast %71 : vector<4x16xf32> to vector<4x16x1xf32>
    %73 = tpu.reciprocal %72 {approx = true} : vector<4x16x1xf32> -> vector<4x16x1xf32>
    %74 = vector.broadcast %73 : vector<4x16x1xf32> to vector<4x16x16xf32>
    %75 = arith.mulf %70, %74 : vector<4x16x16xf32>
    %c0_20 = arith.constant 0 : index
    %c0_21 = arith.constant 0 : index
    %c0_22 = arith.constant 0 : index
    %c0_23 = arith.constant 0 : index
    %76 = vector.load %arg12[%c0_20, %c0_21, %c0_22, %c0_23] : memref<2x4x16x16xf32, #tpu.memory_space<vmem>>, vector<1x4x16x16xf32>
    %77 = vector.shape_cast %76 : vector<1x4x16x16xf32> to vector<4x16x16xf32>
    %78 = vector.shape_cast %75 : vector<4x16x16xf32> to vector<1x4x16x16xf32>
    tpu.vector_store %arg12[%c0_20, %c0_21, %c0_22, %c0_23], %78 {strides = array<i32>} : memref<2x4x16x16xf32, #tpu.memory_space<vmem>>, vector<1x4x16x16xf32>,
    "tpu.trace_start"() <{level = 10 : i32, message = "nqk,nkd->nqd"}> : () -> ()
    %cst_24 = arith.constant dense<0.000000e+00> : vector<4x16x8xf32>
    %79 = tpu.matmul %75, %63, %cst_24 {dimension_numbers = #tpu.dot_dimension_numbers<[2], [1], [1], [2], [0, 0, 0, 1, 1, 2], [0], [0]>} : vector<4x16x16xf32>, vector<4x16x8xf32>, vector<4x16x8xf32> -> vector<4x16x8xf32>
    "tpu.trace_stop"() : () -> ()
    %80 = vector.extract_strided_slice %79 {offsets = [0, 0, 0], sizes = [1, 16, 8], strides = [1, 1, 1]} : vector<4x16x8xf32> to vector<1x16x8xf32>
    %81 = vector.shape_cast %80 : vector<1x16x8xf32> to vector<16x8xf32>
    %82 = vector.extract_strided_slice %79 {offsets = [1, 0, 0], sizes = [1, 16, 8], strides = [1, 1, 1]} : vector<4x16x8xf32> to vector<1x16x8xf32>
    %83 = vector.shape_cast %82 : vector<1x16x8xf32> to vector<16x8xf32>
    %84 = vector.extract_strided_slice %79 {offsets = [2, 0, 0], sizes = [1, 16, 8], strides = [1, 1, 1]} : vector<4x16x8xf32> to vector<1x16x8xf32>
    %85 = vector.shape_cast %84 : vector<1x16x8xf32> to vector<16x8xf32>
    %86 = vector.extract_strided_slice %79 {offsets = [3, 0, 0], sizes = [1, 16, 8], strides = [1, 1, 1]} : vector<4x16x8xf32> to vector<1x16x8xf32>
    %87 = vector.shape_cast %86 : vector<1x16x8xf32> to vector<16x8xf32>
    %88 = tpu.concatenate %81, %83, %85, %87 in 1 : vector<16x8xf32>, vector<16x8xf32>, vector<16x8xf32>, vector<16x8xf32> -> vector<16x32xf32>
    %cst_25 = arith.constant dense<0.000000e+00> : vector<16x32xf32>
    %89 = tpu.matmul %88, %1, %cst_25 {dimension_numbers = #tpu.dot_dimension_numbers<[1], [0], [0], [1], [0, 0, 1, 1], [], []>} : vector<16x32xf32>, vector<32x32xf32>, vector<16x32xf32> -> vector<16x32xf32>
    %90 = arith.addf %89, %13 : vector<16x32xf32>
    %91 = arith.addf %34, %90 : vector<16x32xf32>
    %cst_26 = arith.constant dense<0.000000e+00> : vector<16xf32>
    %92 = vector.multi_reduction <add>, %91, %cst_26 [1] : vector<16x32xf32> to vector<16xf32>
    %93 = vector.shape_cast %92 : vector<16xf32> to vector<16x1xf32>
    %cst_27 = arith.constant 3.200000e+01 : f32
    %94 = vector.broadcast %cst_27 : f32 to vector<16x1xf32>
    %95 = arith.divf %93, %94 : vector<16x1xf32>
    %96 = vector.broadcast %95 : vector<16x1xf32> to vector<16x32xf32>
    %97 = arith.subf %91, %96 : vector<16x32xf32>
    %98 = arith.mulf %97, %97 : vector<16x32xf32>
    %cst_28 = arith.constant dense<0.000000e+00> : vector<16xf32>
    %99 = vector.multi_reduction <add>, %98, %cst_28 [1] : vector<16x32xf32> to vector<16xf32>
    %100 = vector.shape_cast %99 : vector<16xf32> to vector<16x1xf32>
    %cst_29 = arith.constant 3.200000e+01 : f32
    %101 = vector.broadcast %cst_29 : f32 to vector<16x1xf32>
    %102 = arith.divf %100, %101 : vector<16x1xf32>
    %103 = vector.broadcast %95 : vector<16x1xf32> to vector<16x32xf32>
    %104 = arith.subf %91, %103 : vector<16x32xf32>
    %cst_30 = arith.constant 9.99999996E-13 : f32
    %105 = vector.broadcast %cst_30 : f32 to vector<16x1xf32>
    %106 = arith.addf %102, %105 : vector<16x1xf32>
    %107 = math.rsqrt %106 : vector<16x1xf32>
    %108 = vector.broadcast %107 : vector<16x1xf32> to vector<16x32xf32>
    %109 = arith.mulf %104, %108 : vector<16x32xf32>
    %110 = arith.mulf %109, %16 : vector<16x32xf32>
    %111 = arith.addf %110, %19 : vector<16x32xf32>
    %cst_31 = arith.constant dense<0.000000e+00> : vector<16x64xf32>
    %112 = tpu.matmul %111, %2, %cst_31 {dimension_numbers = #tpu.dot_dimension_numbers<[1], [0], [0], [1], [0, 0, 1, 1], [], []>} : vector<16x32xf32>, vector<32x64xf32>, vector<16x64xf32> -> vector<16x64xf32>
    %113 = arith.addf %112, %10 : vector<16x64xf32>
    %cst_32 = arith.constant 5.000000e-01 : f32
    %114 = vector.broadcast %cst_32 : f32 to vector<16x64xf32>
    %115 = arith.mulf %114, %113 : vector<16x64xf32>
    %cst_33 = arith.constant 0.707106769 : f32
    %116 = vector.broadcast %cst_33 : f32 to vector<16x64xf32>
    %117 = arith.mulf %113, %116 : vector<16x64xf32>
    %cst_34 = arith.constant 0.000000e+00 : f32
    %118 = vector.broadcast %cst_34 : f32 to vector<16x64xf32>
    %119 = arith.cmpf olt, %117, %118 : vector<16x64xf32>
    %cst_35 = arith.constant -1.000000e+00 : f32
    %cst_36 = arith.constant 1.000000e+00 : f32
    %120 = vector.broadcast %cst_35 : f32 to vector<16x64xf32>
    %121 = vector.broadcast %cst_36 : f32 to vector<16x64xf32>
    %122 = arith.select %119, %120, %121 : vector<16x64xi1>, vector<16x64xf32>
    %123 = math.absf %117 : vector<16x64xf32>
    %cst_37 = arith.constant 0.327591091 : f32
    %124 = vector.broadcast %cst_37 : f32 to vector<16x64xf32>
    %125 = arith.mulf %124, %123 : vector<16x64xf32>
    %cst_38 = arith.constant 1.000000e+00 : f32
    %126 = vector.broadcast %cst_38 : f32 to vector<16x64xf32>
    %127 = arith.addf %126, %125 : vector<16x64xf32>
    %cst_39 = arith.constant 1.000000e+00 : f32
    %128 = vector.broadcast %cst_39 : f32 to vector<16x64xf32>
    %129 = arith.divf %128, %127 : vector<16x64xf32>
    %cst_40 = arith.constant 1.06140542 : f32
    %130 = vector.broadcast %cst_40 : f32 to vector<16x64xf32>
    %131 = arith.mulf %129, %130 : vector<16x64xf32>
    %cst_41 = arith.constant -1.45315206 : f32
    %132 = vector.broadcast %cst_41 : f32 to vector<16x64xf32>
    %133 = arith.addf %132, %131 : vector<16x64xf32>
    %134 = arith.mulf %129, %133 : vector<16x64xf32>
    %cst_42 = arith.constant 1.42141378 : f32
    %135 = vector.broadcast %cst_42 : f32 to vector<16x64xf32>
    %136 = arith.addf %135, %134 : vector<16x64xf32>
    %137 = arith.mulf %129, %136 : vector<16x64xf32>
    %cst_43 = arith.constant -0.284496725 : f32
    %138 = vector.broadcast %cst_43 : f32 to vector<16x64xf32>
    %139 = arith.addf %138, %137 : vector<16x64xf32>
    %140 = arith.mulf %129, %139 : vector<16x64xf32>
    %cst_44 = arith.constant 0.254829586 : f32
    %141 = vector.broadcast %cst_44 : f32 to vector<16x64xf32>
    %142 = arith.addf %141, %140 : vector<16x64xf32>
    %143 = arith.mulf %129, %142 : vector<16x64xf32>
    %cst_45 = arith.constant 0.000000e+00 : f32
    %144 = vector.broadcast %cst_45 : f32 to vector<16x64xf32>
    %145 = arith.subf %144, %123 : vector<16x64xf32>
    %146 = arith.mulf %145, %123 : vector<16x64xf32>
    %147 = math.exp %146 : vector<16x64xf32>
    %148 = arith.mulf %143, %147 : vector<16x64xf32>
    %cst_46 = arith.constant 1.000000e+00 : f32
    %149 = vector.broadcast %cst_46 : f32 to vector<16x64xf32>
    %150 = arith.subf %149, %148 : vector<16x64xf32>
    %151 = arith.mulf %122, %150 : vector<16x64xf32>
    %cst_47 = arith.constant 1.000000e+00 : f32
    %152 = vector.broadcast %cst_47 : f32 to vector<16x64xf32>
    %153 = arith.addf %152, %151 : vector<16x64xf32>
    %154 = arith.mulf %115, %153 : vector<16x64xf32>
    %cst_48 = arith.constant dense<0.000000e+00> : vector<16x32xf32>
    %155 = tpu.matmul %154, %3, %cst_48 {dimension_numbers = #tpu.dot_dimension_numbers<[1], [0], [0], [1], [0, 0, 1, 1], [], []>} : vector<16x64xf32>, vector<64x32xf32>, vector<16x32xf32> -> vector<16x32xf32>
    %156 = arith.addf %155, %22 : vector<16x32xf32>
    %157 = arith.addf %156, %111 : vector<16x32xf32>
    %cst_49 = arith.constant dense<0.000000e+00> : vector<16xf32>
    %158 = vector.multi_reduction <add>, %157, %cst_49 [1] : vector<16x32xf32> to vector<16xf32>
    %159 = vector.shape_cast %158 : vector<16xf32> to vector<16x1xf32>
    %cst_50 = arith.constant 3.200000e+01 : f32
    %160 = vector.broadcast %cst_50 : f32 to vector<16x1xf32>
    %161 = arith.divf %159, %160 : vector<16x1xf32>
    %162 = vector.broadcast %161 : vector<16x1xf32> to vector<16x32xf32>
    %163 = arith.subf %157, %162 : vector<16x32xf32>
    %164 = arith.mulf %163, %163 : vector<16x32xf32>
    %cst_51 = arith.constant dense<0.000000e+00> : vector<16xf32>
    %165 = vector.multi_reduction <add>, %164, %cst_51 [1] : vector<16x32xf32> to vector<16xf32>
    %166 = vector.shape_cast %165 : vector<16xf32> to vector<16x1xf32>
    %cst_52 = arith.constant 3.200000e+01 : f32
    %167 = vector.broadcast %cst_52 : f32 to vector<16x1xf32>
    %168 = arith.divf %166, %167 : vector<16x1xf32>
    %169 = vector.broadcast %161 : vector<16x1xf32> to vector<16x32xf32>
    %170 = arith.subf %157, %169 : vector<16x32xf32>
    %cst_53 = arith.constant 9.99999996E-13 : f32
    %171 = vector.broadcast %cst_53 : f32 to vector<16x1xf32>
    %172 = arith.addf %168, %171 : vector<16x1xf32>
    %173 = math.rsqrt %172 : vector<16x1xf32>
    %174 = vector.broadcast %173 : vector<16x1xf32> to vector<16x32xf32>
    %175 = arith.mulf %170, %174 : vector<16x32xf32>
    %176 = arith.mulf %175, %25 : vector<16x32xf32>
    %177 = arith.addf %176, %28 : vector<16x32xf32>
    %cst_54 = arith.constant dense<0.000000e+00> : vector<16x96xf32>
    %178 = tpu.matmul %177, %0, %cst_54 {dimension_numbers = #tpu.dot_dimension_numbers<[1], [0], [0], [1], [0, 0, 1, 1], [], []>} : vector<16x32xf32>, vector<32x96xf32>, vector<16x96xf32> -> vector<16x96xf32>
    %179 = arith.addf %178, %7 : vector<16x96xf32>
    %180 = vector.extract_strided_slice %179 {offsets = [0, 0], sizes = [16, 8], strides = [1, 1]} : vector<16x96xf32> to vector<16x8xf32>
    %181 = vector.extract_strided_slice %179 {offsets = [0, 8], sizes = [16, 8], strides = [1, 1]} : vector<16x96xf32> to vector<16x8xf32>
    %182 = vector.extract_strided_slice %179 {offsets = [0, 16], sizes = [16, 8], strides = [1, 1]} : vector<16x96xf32> to vector<16x8xf32>
    %183 = vector.extract_strided_slice %179 {offsets = [0, 24], sizes = [16, 8], strides = [1, 1]} : vector<16x96xf32> to vector<16x8xf32>
    %184 = vector.shape_cast %180 : vector<16x8xf32> to vector<1x16x8xf32>
    %185 = vector.shape_cast %181 : vector<16x8xf32> to vector<1x16x8xf32>
    %186 = vector.shape_cast %182 : vector<16x8xf32> to vector<1x16x8xf32>
    %187 = vector.shape_cast %183 : vector<16x8xf32> to vector<1x16x8xf32>
    %188 = tpu.concatenate %184, %185, %186, %187 in 0 : vector<1x16x8xf32>, vector<1x16x8xf32>, vector<1x16x8xf32>, vector<1x16x8xf32> -> vector<4x16x8xf32>
    %189 = vector.extract_strided_slice %179 {offsets = [0, 32], sizes = [16, 8], strides = [1, 1]} : vector<16x96xf32> to vector<16x8xf32>
    %190 = vector.extract_strided_slice %179 {offsets = [0, 40], sizes = [16, 8], strides = [1, 1]} : vector<16x96xf32> to vector<16x8xf32>
    %191 = vector.extract_strided_slice %179 {offsets = [0, 48], sizes = [16, 8], strides = [1, 1]} : vector<16x96xf32> to vector<16x8xf32>
    %192 = vector.extract_strided_slice %179 {offsets = [0, 56], sizes = [16, 8], strides = [1, 1]} : vector<16x96xf32> to vector<16x8xf32>
    %193 = vector.shape_cast %189 : vector<16x8xf32> to vector<1x16x8xf32>
    %194 = vector.shape_cast %190 : vector<16x8xf32> to vector<1x16x8xf32>
    %195 = vector.shape_cast %191 : vector<16x8xf32> to vector<1x16x8xf32>
    %196 = vector.shape_cast %192 : vector<16x8xf32> to vector<1x16x8xf32>
    %197 = tpu.concatenate %193, %194, %195, %196 in 0 : vector<1x16x8xf32>, vector<1x16x8xf32>, vector<1x16x8xf32>, vector<1x16x8xf32> -> vector<4x16x8xf32>
    %198 = vector.extract_strided_slice %179 {offsets = [0, 64], sizes = [16, 8], strides = [1, 1]} : vector<16x96xf32> to vector<16x8xf32>
    %199 = vector.extract_strided_slice %179 {offsets = [0, 72], sizes = [16, 8], strides = [1, 1]} : vector<16x96xf32> to vector<16x8xf32>
    %200 = vector.extract_strided_slice %179 {offsets = [0, 80], sizes = [16, 8], strides = [1, 1]} : vector<16x96xf32> to vector<16x8xf32>
    %201 = vector.extract_strided_slice %179 {offsets = [0, 88], sizes = [16, 8], strides = [1, 1]} : vector<16x96xf32> to vector<16x8xf32>
    %202 = vector.shape_cast %198 : vector<16x8xf32> to vector<1x16x8xf32>
    %203 = vector.shape_cast %199 : vector<16x8xf32> to vector<1x16x8xf32>
    %204 = vector.shape_cast %200 : vector<16x8xf32> to vector<1x16x8xf32>
    %205 = vector.shape_cast %201 : vector<16x8xf32> to vector<1x16x8xf32>
    %206 = tpu.concatenate %202, %203, %204, %205 in 0 : vector<1x16x8xf32>, vector<1x16x8xf32>, vector<1x16x8xf32>, vector<1x16x8xf32> -> vector<4x16x8xf32>
    "tpu.trace_start"() <{level = 10 : i32, message = "nqd,nkd->nqk"}> : () -> ()
    %cst_55 = arith.constant dense<0.000000e+00> : vector<4x16x16xf32>
    %207 = tpu.matmul %188, %197, %cst_55 {dimension_numbers = #tpu.dot_dimension_numbers<[2], [2], [1], [1], [0, 0, 0, 1, 1, 1], [0], [0]>} : vector<4x16x8xf32>, vector<4x16x8xf32>, vector<4x16x16xf32> -> vector<4x16x16xf32>
    "tpu.trace_stop"() : () -> ()
    %208 = arith.addf %207, %33 : vector<4x16x16xf32>
    %cst_56 = arith.constant dense<0xFF800000> : vector<4x16xf32>
    %209 = vector.multi_reduction <maximumf>, %208, %cst_56 [2] : vector<4x16x16xf32> to vector<4x16xf32>
    %210 = vector.shape_cast %209 : vector<4x16xf32> to vector<4x16x1xf32>
    %211 = vector.broadcast %210 : vector<4x16x1xf32> to vector<4x16x16xf32>
    %212 = arith.subf %208, %211 : vector<4x16x16xf32>
    %213 = math.exp %212 : vector<4x16x16xf32>
    %cst_57 = arith.constant dense<0.000000e+00> : vector<4x16xf32>
    %214 = vector.multi_reduction <add>, %213, %cst_57 [2] : vector<4x16x16xf32> to vector<4x16xf32>
    %215 = vector.shape_cast %214 : vector<4x16xf32> to vector<4x16x1xf32>
    %216 = tpu.reciprocal %215 {approx = true} : vector<4x16x1xf32> -> vector<4x16x1xf32>
    %217 = vector.broadcast %216 : vector<4x16x1xf32> to vector<4x16x16xf32>
    %218 = arith.mulf %213, %217 : vector<4x16x16xf32>
    %c1 = arith.constant 1 : index
    %c0_58 = arith.constant 0 : index
    %c0_59 = arith.constant 0 : index
    %c0_60 = arith.constant 0 : index
    %219 = vector.load %arg12[%c1, %c0_58, %c0_59, %c0_60] : memref<2x4x16x16xf32, #tpu.memory_space<vmem>>, vector<1x4x16x16xf32>
    %220 = vector.shape_cast %219 : vector<1x4x16x16xf32> to vector<4x16x16xf32>
    %221 = vector.shape_cast %218 : vector<4x16x16xf32> to vector<1x4x16x16xf32>
    tpu.vector_store %arg12[%c1, %c0_58, %c0_59, %c0_60], %221 {strides = array<i32>} : memref<2x4x16x16xf32, #tpu.memory_space<vmem>>, vector<1x4x16x16xf32>,
    "tpu.trace_start"() <{level = 10 : i32, message = "nqk,nkd->nqd"}> : () -> ()
    %cst_61 = arith.constant dense<0.000000e+00> : vector<4x16x8xf32>
    %222 = tpu.matmul %218, %206, %cst_61 {dimension_numbers = #tpu.dot_dimension_numbers<[2], [1], [1], [2], [0, 0, 0, 1, 1, 2], [0], [0]>} : vector<4x16x16xf32>, vector<4x16x8xf32>, vector<4x16x8xf32> -> vector<4x16x8xf32>
    "tpu.trace_stop"() : () -> ()
    %223 = vector.extract_strided_slice %222 {offsets = [0, 0, 0], sizes = [1, 16, 8], strides = [1, 1, 1]} : vector<4x16x8xf32> to vector<1x16x8xf32>
    %224 = vector.shape_cast %223 : vector<1x16x8xf32> to vector<16x8xf32>
    %225 = vector.extract_strided_slice %222 {offsets = [1, 0, 0], sizes = [1, 16, 8], strides = [1, 1, 1]} : vector<4x16x8xf32> to vector<1x16x8xf32>
    %226 = vector.shape_cast %225 : vector<1x16x8xf32> to vector<16x8xf32>
    %227 = vector.extract_strided_slice %222 {offsets = [2, 0, 0], sizes = [1, 16, 8], strides = [1, 1, 1]} : vector<4x16x8xf32> to vector<1x16x8xf32>
    %228 = vector.shape_cast %227 : vector<1x16x8xf32> to vector<16x8xf32>
    %229 = vector.extract_strided_slice %222 {offsets = [3, 0, 0], sizes = [1, 16, 8], strides = [1, 1, 1]} : vector<4x16x8xf32> to vector<1x16x8xf32>
    %230 = vector.shape_cast %229 : vector<1x16x8xf32> to vector<16x8xf32>
    %231 = tpu.concatenate %224, %226, %228, %230 in 1 : vector<16x8xf32>, vector<16x8xf32>, vector<16x8xf32>, vector<16x8xf32> -> vector<16x32xf32>
    %cst_62 = arith.constant dense<0.000000e+00> : vector<16x32xf32>
    %232 = tpu.matmul %231, %1, %cst_62 {dimension_numbers = #tpu.dot_dimension_numbers<[1], [0], [0], [1], [0, 0, 1, 1], [], []>} : vector<16x32xf32>, vector<32x32xf32>, vector<16x32xf32> -> vector<16x32xf32>
    %233 = arith.addf %232, %13 : vector<16x32xf32>
    %234 = arith.addf %177, %233 : vector<16x32xf32>
    %cst_63 = arith.constant dense<0.000000e+00> : vector<16xf32>
    %235 = vector.multi_reduction <add>, %234, %cst_63 [1] : vector<16x32xf32> to vector<16xf32>
    %236 = vector.shape_cast %235 : vector<16xf32> to vector<16x1xf32>
    %cst_64 = arith.constant 3.200000e+01 : f32
    %237 = vector.broadcast %cst_64 : f32 to vector<16x1xf32>
    %238 = arith.divf %236, %237 : vector<16x1xf32>
    %239 = vector.broadcast %238 : vector<16x1xf32> to vector<16x32xf32>
    %240 = arith.subf %234, %239 : vector<16x32xf32>
    %241 = arith.mulf %240, %240 : vector<16x32xf32>
    %cst_65 = arith.constant dense<0.000000e+00> : vector<16xf32>
    %242 = vector.multi_reduction <add>, %241, %cst_65 [1] : vector<16x32xf32> to vector<16xf32>
    %243 = vector.shape_cast %242 : vector<16xf32> to vector<16x1xf32>
    %cst_66 = arith.constant 3.200000e+01 : f32
    %244 = vector.broadcast %cst_66 : f32 to vector<16x1xf32>
    %245 = arith.divf %243, %244 : vector<16x1xf32>
    %246 = vector.broadcast %238 : vector<16x1xf32> to vector<16x32xf32>
    %247 = arith.subf %234, %246 : vector<16x32xf32>
    %cst_67 = arith.constant 9.99999996E-13 : f32
    %248 = vector.broadcast %cst_67 : f32 to vector<16x1xf32>
    %249 = arith.addf %245, %248 : vector<16x1xf32>
    %250 = math.rsqrt %249 : vector<16x1xf32>
    %251 = vector.broadcast %250 : vector<16x1xf32> to vector<16x32xf32>
    %252 = arith.mulf %247, %251 : vector<16x32xf32>
    %253 = arith.mulf %252, %16 : vector<16x32xf32>
    %254 = arith.addf %253, %19 : vector<16x32xf32>
    %cst_68 = arith.constant dense<0.000000e+00> : vector<16x64xf32>
    %255 = tpu.matmul %254, %2, %cst_68 {dimension_numbers = #tpu.dot_dimension_numbers<[1], [0], [0], [1], [0, 0, 1, 1], [], []>} : vector<16x32xf32>, vector<32x64xf32>, vector<16x64xf32> -> vector<16x64xf32>
    %256 = arith.addf %255, %10 : vector<16x64xf32>
    %cst_69 = arith.constant 5.000000e-01 : f32
    %257 = vector.broadcast %cst_69 : f32 to vector<16x64xf32>
    %258 = arith.mulf %257, %256 : vector<16x64xf32>
    %cst_70 = arith.constant 0.707106769 : f32
    %259 = vector.broadcast %cst_70 : f32 to vector<16x64xf32>
    %260 = arith.mulf %256, %259 : vector<16x64xf32>
    %cst_71 = arith.constant 0.000000e+00 : f32
    %261 = vector.broadcast %cst_71 : f32 to vector<16x64xf32>
    %262 = arith.cmpf olt, %260, %261 : vector<16x64xf32>
    %cst_72 = arith.constant -1.000000e+00 : f32
    %cst_73 = arith.constant 1.000000e+00 : f32
    %263 = vector.broadcast %cst_72 : f32 to vector<16x64xf32>
    %264 = vector.broadcast %cst_73 : f32 to vector<16x64xf32>
    %265 = arith.select %262, %263, %264 : vector<16x64xi1>, vector<16x64xf32>
    %266 = math.absf %260 : vector<16x64xf32>
    %cst_74 = arith.constant 0.327591091 : f32
    %267 = vector.broadcast %cst_74 : f32 to vector<16x64xf32>
    %268 = arith.mulf %267, %266 : vector<16x64xf32>
    %cst_75 = arith.constant 1.000000e+00 : f32
    %269 = vector.broadcast %cst_75 : f32 to vector<16x64xf32>
    %270 = arith.addf %269, %268 : vector<16x64xf32>
    %cst_76 = arith.constant 1.000000e+00 : f32
    %271 = vector.broadcast %cst_76 : f32 to vector<16x64xf32>
    %272 = arith.divf %271, %270 : vector<16x64xf32>
    %cst_77 = arith.constant 1.06140542 : f32
    %273 = vector.broadcast %cst_77 : f32 to vector<16x64xf32>
    %274 = arith.mulf %272, %273 : vector<16x64xf32>
    %cst_78 = arith.constant -1.45315206 : f32
    %275 = vector.broadcast %cst_78 : f32 to vector<16x64xf32>
    %276 = arith.addf %275, %274 : vector<16x64xf32>
    %277 = arith.mulf %272, %276 : vector<16x64xf32>
    %cst_79 = arith.constant 1.42141378 : f32
    %278 = vector.broadcast %cst_79 : f32 to vector<16x64xf32>
    %279 = arith.addf %278, %277 : vector<16x64xf32>
    %280 = arith.mulf %272, %279 : vector<16x64xf32>
    %cst_80 = arith.constant -0.284496725 : f32
    %281 = vector.broadcast %cst_80 : f32 to vector<16x64xf32>
    %282 = arith.addf %281, %280 : vector<16x64xf32>
    %283 = arith.mulf %272, %282 : vector<16x64xf32>
    %cst_81 = arith.constant 0.254829586 : f32
    %284 = vector.broadcast %cst_81 : f32 to vector<16x64xf32>
    %285 = arith.addf %284, %283 : vector<16x64xf32>
    %286 = arith.mulf %272, %285 : vector<16x64xf32>
    %cst_82 = arith.constant 0.000000e+00 : f32
    %287 = vector.broadcast %cst_82 : f32 to vector<16x64xf32>
    %288 = arith.subf %287, %266 : vector<16x64xf32>
    %289 = arith.mulf %288, %266 : vector<16x64xf32>
    %290 = math.exp %289 : vector<16x64xf32>
    %291 = arith.mulf %286, %290 : vector<16x64xf32>
    %cst_83 = arith.constant 1.000000e+00 : f32
    %292 = vector.broadcast %cst_83 : f32 to vector<16x64xf32>
    %293 = arith.subf %292, %291 : vector<16x64xf32>
    %294 = arith.mulf %265, %293 : vector<16x64xf32>
    %cst_84 = arith.constant 1.000000e+00 : f32
    %295 = vector.broadcast %cst_84 : f32 to vector<16x64xf32>
    %296 = arith.addf %295, %294 : vector<16x64xf32>
    %297 = arith.mulf %258, %296 : vector<16x64xf32>
    %cst_85 = arith.constant dense<0.000000e+00> : vector<16x32xf32>
    %298 = tpu.matmul %297, %3, %cst_85 {dimension_numbers = #tpu.dot_dimension_numbers<[1], [0], [0], [1], [0, 0, 1, 1], [], []>} : vector<16x64xf32>, vector<64x32xf32>, vector<16x32xf32> -> vector<16x32xf32>
    %299 = arith.addf %298, %22 : vector<16x32xf32>
    %300 = arith.addf %299, %254 : vector<16x32xf32>
    %cst_86 = arith.constant dense<0.000000e+00> : vector<16xf32>
    %301 = vector.multi_reduction <add>, %300, %cst_86 [1] : vector<16x32xf32> to vector<16xf32>
    %302 = vector.shape_cast %301 : vector<16xf32> to vector<16x1xf32>
    %cst_87 = arith.constant 3.200000e+01 : f32
    %303 = vector.broadcast %cst_87 : f32 to vector<16x1xf32>
    %304 = arith.divf %302, %303 : vector<16x1xf32>
    %305 = vector.broadcast %304 : vector<16x1xf32> to vector<16x32xf32>
    %306 = arith.subf %300, %305 : vector<16x32xf32>
    %307 = arith.mulf %306, %306 : vector<16x32xf32>
    %cst_88 = arith.constant dense<0.000000e+00> : vector<16xf32>
    %308 = vector.multi_reduction <add>, %307, %cst_88 [1] : vector<16x32xf32> to vector<16xf32>
    %309 = vector.shape_cast %308 : vector<16xf32> to vector<16x1xf32>
    %cst_89 = arith.constant 3.200000e+01 : f32
    %310 = vector.broadcast %cst_89 : f32 to vector<16x1xf32>
    %311 = arith.divf %309, %310 : vector<16x1xf32>
    %312 = vector.broadcast %304 : vector<16x1xf32> to vector<16x32xf32>
    %313 = arith.subf %300, %312 : vector<16x32xf32>
    %cst_90 = arith.constant 9.99999996E-13 : f32
    %314 = vector.broadcast %cst_90 : f32 to vector<16x1xf32>
    %315 = arith.addf %311, %314 : vector<16x1xf32>
    %316 = math.rsqrt %315 : vector<16x1xf32>
    %317 = vector.broadcast %316 : vector<16x1xf32> to vector<16x32xf32>
    %318 = arith.mulf %313, %317 : vector<16x32xf32>
    %319 = arith.mulf %318, %25 : vector<16x32xf32>
    %320 = arith.addf %319, %28 : vector<16x32xf32>
    %321 = vector.extract_strided_slice %320 {offsets = [0, 0], sizes = [1, 32], strides = [1, 1]} : vector<16x32xf32> to vector<1x32xf32>
    %322 = vector.extract_strided_slice %320 {offsets = [8, 0], sizes = [1, 32], strides = [1, 1]} : vector<16x32xf32> to vector<1x32xf32>
    %323 = tpu.concatenate %321, %322 in 0 : vector<1x32xf32>, vector<1x32xf32> -> vector<2x32xf32>
    %c0_91 = arith.constant 0 : index
    %c0_92 = arith.constant 0 : index
    %324 = vector.load %arg9[%c0_91, %c0_92] : memref<32x32xf32, #tpu.memory_space<vmem>>, vector<32x32xf32>
    %cst_93 = arith.constant dense<0.000000e+00> : vector<2x32xf32>
    %325 = tpu.matmul %323, %324, %cst_93 {dimension_numbers = #tpu.dot_dimension_numbers<[1], [0], [0], [1], [0, 0, 1, 1], [], []>} : vector<2x32xf32>, vector<32x32xf32>, vector<2x32xf32> -> vector<2x32xf32>
    %326 = vector.broadcast %29 : vector<1x32xf32> to vector<2x32xf32>
    %327 = arith.addf %325, %326 : vector<2x32xf32>
    %328 = math.tanh %327 : vector<2x32xf32>
    %c0_94 = arith.constant 0 : index
    %c0_95 = arith.constant 0 : index
    %329 = vector.load %arg10[%c0_94, %c0_95] : memref<32x2xf32, #tpu.memory_space<vmem>>, vector<32x2xf32>
    %cst_96 = arith.constant dense<0.000000e+00> : vector<2x2xf32>
    %330 = tpu.matmul %328, %329, %cst_96 {dimension_numbers = #tpu.dot_dimension_numbers<[1], [0], [0], [1], [0, 0, 1, 1], [], []>} : vector<2x32xf32>, vector<32x2xf32>, vector<2x2xf32> -> vector<2x2xf32>
    %c0_97 = arith.constant 0 : index
    %c0_98 = arith.constant 0 : index
    %331 = vector.load %arg11[%c0_97, %c0_98] : memref<2x2xf32, #tpu.memory_space<vmem>>, vector<2x2xf32>
    tpu.vector_store %arg11[%c0_97, %c0_98], %330 {strides = array<i32>} : memref<2x2xf32, #tpu.memory_space<vmem>>, vector<2x2xf32>,
    return
  }
}

</mosaic_0001>

<bundles_post_ra>
// kernel: tpu_custom_call.1
= control target key start
LH: loop header
LB: loop body
LE: loop exit
PB: predicated region body
PF: predicated region fallthrough
CT: control target
= control target key end

     0   :  { %18 = vsyncpa [#allocation3], 0  ;;  %s4605_s0 = inlined_call_operand.hbm [shape: f32[16,32], index: 0, kind: input, shape index: {}]   ;;  %s4606_s1 = inlined_call_operand.hbm [shape: f32[16,16], index: 1, kind: input, shape index: {}]   ;;  %s4607_s2 = inlined_call_operand.vmem [shape: f32[32,96], index: 2, kind: input, shape index: {}]   ;;  %s4608_s3 = inlined_call_operand.hbm [shape: f32[1,96], index: 3, kind: input, shape index: {}]   ;;  %s4609_s4 = inlined_call_operand.vmem [shape: f32[32,32], index: 4, kind: input, shape index: {}]   ;;  %s4610_s5 = inlined_call_operand.vmem [shape: f32[32,64], index: 5, kind: input, shape index: {}]   ;;  %s4611_s6 = inlined_call_operand.hbm [shape: f32[1,64], index: 6, kind: input, shape index: {}]   ;;  %s4612_s7 = inlined_call_operand.vmem [shape: f32[64,32], index: 7, kind: input, shape index: {}]   ;;  %s4613_s8 = inlined_call_operand.hbm [shape: f32[8,32], index: 8, kind: input, shape index: {}]   ;;  %s4614_s9 = inlined_call_operand.vmem [shape: f32[32,32], index: 9, kind: input, shape index: {}]   ;;  %s4615_s10 = inlined_call_operand.vmem [shape: f32[32,2], index: 10, kind: input, shape index: {}]   ;;  %s4616_s11 = inlined_call_operand.hbm [shape: f32[2,2], index: 11, kind: output, shape index: {0}]   ;;  %s4617_s12 = inlined_call_operand.hbm [shape: f32[2,4,16,16], index: 12, kind: output, shape index: {1}]  }
   0x1   :  { %19 = vsyncpa [#allocation6], 0 }
   0x2   :  { %20 = vsyncpa [#allocation9], 0 }
   0x3   :  { %21 = vsyncpa [#allocation4], 0 }
   0x4   :  { %22 = vsyncpa [#allocation13], 0  ;;  %s3900_s21 = smov [#allocation5]   ;;  %s3901_s23 = smov [#allocation8]  }
   0x5   :  { %s40_s22 = sshll.u32 %s3900_s21, 4  ;;  %s69_s24 = sshll.u32 %s3901_s23, 4  ;;  %s41_s22 = int_to_ptr.vmem [resolvable:$true] %s40_s22  ;;  %s3985_s24 = int_to_ptr.vmem [resolvable:$true] %s69_s24 }
   0x6   :  { %s3736_s27 = scalar_lea.hbm %s4606_s1, 256 }
   0x7   :  { %p3737_p0 = scmp.ne.s32.totalorder %s4606_s1, %s3736_s27  ;;  %p3740_p1 = scmp.lt.u32.totalorder %s3736_s27, %s4606_s1 }
   0x9   :  { %p3742_p2 = pnand %p3740_p1, %p3737_p0 }
   0xb   :  { %3745 = shalt.err (!%p3742_p2)
}
   0xc   :  { %s3746_s14 = scalar_lea.vmem %s41_s22, 256  ;;  %p3751_p4 = scmp.lt.s32.totalorder %s41_s22, %s41_s22 }
   0xd   :  { %p3747_p3 = scmp.ne.s32.totalorder %s41_s22, %s3746_s14  ;;  %p3752_p5 = scmp.lt.s32.totalorder %s3746_s14, %s3746_s14 }
   0xf   :  { %p3753_p6 = por %p3752_p5, %p3751_p4 }
  0x11   :  { %p3754_p7 = pnand %p3753_p6, %p3747_p3 }
  0x13   :  { %3757 = shalt.err (!%p3754_p7)
}
  0x14   :  { %s3902_s15 = smov 128   ;;  %s3903_s16 = smov 8  }
  0x15   :  { %46 = dma.hbm_to_vmem [thread:$0]  %s4606_s1, 256, %s41_s22, [#allocation6], %s3902_s15, %s3902_s15, %s3903_s16  }
  0x16   :  { %s3758_s21 = scalar_lea.hbm %s4611_s6, 16 }
  0x17   :  { %p3759_p8 = scmp.ne.s32.totalorder %s4611_s6, %s3758_s21  ;;  %p3762_p9 = scmp.lt.u32.totalorder %s3758_s21, %s4611_s6 }
  0x19   :  { %p3764_p10 = pnand %p3762_p9, %p3759_p8 }
  0x1b   :  { %3767 = shalt.err (!%p3764_p10)
}
  0x1c   :  { %s3768_s28 = scalar_lea.vmem %s3985_s24, 16  ;;  %s3772_s1 = scalar_lea.vmem %s3985_s24, 32 }
  0x1d   :  { %p3769_p11 = scmp.ne.s32.totalorder %s3985_s24, %s3768_s28  ;;  %p3773_p12 = scmp.lt.s32.totalorder %s3985_s24, %s3985_s24 }
  0x1e   :  { %p3774_p13 = scmp.lt.s32.totalorder %s3772_s1, %s3768_s28 }
  0x20   :  { %p3775_p0 = por %p3774_p13, %p3773_p12 }
  0x22   :  { %p3776_p1 = pnand %p3775_p0, %p3769_p11 }
  0x24   :  { %3779 = shalt.err (!%p3776_p1)
}
  0x25   :  { %72 = dma.hbm_to_vmem [thread:$0]  %s4611_s6, 16, %s3985_s24, [#allocation9]  }
  0x26   :  { %s3904_s30 = smov [#allocation2]   ;;  %s3905_s14 = smov [#allocation7]  }
  0x27   :  { %s28_s13 = sshll.u32 %s3904_s30, 4  ;;  %s55_s17 = sshll.u32 %s3905_s14, 4  ;;  %s29_s13 = int_to_ptr.vmem [resolvable:$true] %s28_s13  ;;  %s56_s17 = int_to_ptr.vmem [resolvable:$true] %s55_s17 }
  0x28   :  { %s3780_s20 = scalar_lea.hbm %s4605_s0, 256 }
  0x29   :  { %p3781_p2 = scmp.ne.s32.totalorder %s4605_s0, %s3780_s20  ;;  %p3784_p3 = scmp.lt.u32.totalorder %s3780_s20, %s4605_s0 }
  0x2b   :  { %p3786_p4 = pnand %p3784_p3, %p3781_p2 }
  0x2d   :  { %3789 = shalt.err (!%p3786_p4)
}
  0x2e   :  { %s3790_s6 = scalar_lea.vmem %s29_s13, 256  ;;  %p3795_p6 = scmp.lt.s32.totalorder %s29_s13, %s29_s13 }
  0x2f   :  { %p3791_p5 = scmp.ne.s32.totalorder %s29_s13, %s3790_s6  ;;  %p3796_p7 = scmp.lt.s32.totalorder %s3790_s6, %s3790_s6 }
  0x31   :  { %p3797_p8 = por %p3796_p7, %p3795_p6 }
  0x33   :  { %p3798_p9 = pnand %p3797_p8, %p3791_p5 }
  0x35   :  { %3801 = shalt.err (!%p3798_p9)
}
  0x36   :  { %34 = dma.hbm_to_vmem [thread:$0]  %s4605_s0, 256, %s29_s13, [#allocation3], %s3902_s15, %s3902_s15, %s3903_s16  }
  0x37   :  { %s3802_s22 = scalar_lea.hbm %s4608_s3, 16 }
  0x38   :  { %p3803_p10 = scmp.ne.s32.totalorder %s4608_s3, %s3802_s22  ;;  %p3806_p11 = scmp.lt.u32.totalorder %s3802_s22, %s4608_s3 }
  0x3a   :  { %p3808_p12 = pnand %p3806_p11, %p3803_p10 }
  0x3c   :  { %3811 = shalt.err (!%p3808_p12)
}
  0x3d   :  { %s3812_s19 = scalar_lea.vmem %s56_s17, 16  ;;  %s3816_s20 = scalar_lea.vmem %s56_s17, 32 }
  0x3e   :  { %p3813_p13 = scmp.ne.s32.totalorder %s56_s17, %s3812_s19  ;;  %p3817_p0 = scmp.lt.s32.totalorder %s56_s17, %s56_s17 }
  0x3f   :  { %p3818_p1 = scmp.lt.s32.totalorder %s3816_s20, %s3812_s19 }
  0x41   :  { %p3819_p2 = por %p3818_p1, %p3817_p0 }
  0x43   :  { %p3820_p3 = pnand %p3819_p2, %p3813_p13 }
  0x45   :  { %3823 = shalt.err (!%p3820_p3)
}
  0x46   :  { %58 = dma.hbm_to_vmem [thread:$0]  %s4608_s3, 16, %s56_s17, [#allocation6]  }
  0x47   :  { %s3906_s21 = smov [#allocation10]   ;;  %s3824_s6 = scalar_lea.hbm %s4613_s8, 128 }
  0x48   :  { %s81_s23 = sshll.u32 %s3906_s21, 4  ;;  %p3825_p4 = scmp.ne.s32.totalorder %s4613_s8, %s3824_s6  ;;  %s82_s23 = int_to_ptr.vmem [resolvable:$true] %s81_s23 }
  0x49   :  { %p3828_p5 = scmp.lt.u32.totalorder %s3824_s6, %s4613_s8 }
  0x4b   :  { %p3830_p6 = pnand %p3828_p5, %p3825_p4 }
  0x4d   :  { %3833 = shalt.err (!%p3830_p6)
}
  0x4e   :  { %s3834_s22 = scalar_lea.vmem %s82_s23, 128  ;;  %p3839_p8 = scmp.lt.s32.totalorder %s82_s23, %s82_s23 }
  0x4f   :  { %p3835_p7 = scmp.ne.s32.totalorder %s82_s23, %s3834_s22  ;;  %p3840_p9 = scmp.lt.s32.totalorder %s3834_s22, %s3834_s22 }
  0x51   :  { %p3841_p10 = por %p3840_p9, %p3839_p8 }
  0x53   :  { %p3842_p11 = pnand %p3841_p10, %p3835_p7 }
  0x55   :  { %3845 = shalt.err (!%p3842_p11)
}
  0x56   :  { %84 = dma.hbm_to_vmem [thread:$0]  %s4613_s8, 128, %s82_s23, [#allocation9]  }
  0x57   :  { %3890 = dma.done.wait [#allocation3], 256  }
  0x58   :  { %3891 = vsyncadd [#allocation3], 4294967040 }
  0x59   :  { %3892 = dma.done.wait [#allocation6], 272  }
  0x5a   :  { %3893 = vsyncadd [#allocation6], 4294967024 }
  0x5b   :  { %3894 = dma.done.wait [#allocation9], 144  }
  0x5c   :  { %3895 = vsyncadd [#allocation9], 4294967152  ;;  %vm167_vm0 = vcmask 261120   ;;  %v104_v0 = vld [vmem:[%s4607_s2] sm:$0xff]  ;;  %v105_v1 = vld [vmem:[%s4607_s2 + $0x8] sm:$0xff]  ;;  %vm267_vm1 = vcmask 64512  }
  0x5d   :  { %v106_v2 = vld [vmem:[%s4607_s2 + $0x10] sm:$0xff]  ;;  %v4068_v3 = vpack.c.bf16 %v105_v1, %v104_v0  ;;  %v107_v4 = vld [vmem:[%s4607_s2 + $0x18] sm:$0xff]  ;;  %v4073_v5 = vld [vmem:[#allocation2] sm:$0xff]  ;;  %s3907_s2 = smov 112   ;;  %s3908_s13 = smov 120   ;;  %vm612_vm3 = vcmask 130048  }
  0x5e   :  { %v4075_v6 = vpack.c.bf16 %v107_v4, %v106_v2  ;;  %3135 = vmatprep.mubr.msk.f32.mxu0 %vm167_vm0, %v4073_v5  ;;  %v4083_v7 = vld [vmem:[#allocation2 + $0x8] sm:$0xff]  ;;  %v4087_v8 = vld [vmem:[#allocation7] ss:$0 sm:$0xff]  ;;  %s3909_s21 = smov 104   ;;  %s3910_s23 = smov 96   ;;  %vm4117_vm2 = vmpackc.low %vm267_vm1, %vm267_vm1  ;;  %vm1085_vm4 = vcmask 195584  }
  0x5f   :  { %3366 = vmatprep.subr.bf16.mxu0 %v4068_v3  ;;  %v4143_v40 = vld [vmem:[#allocation5 + $0x8] sm:$0xff]  ;;  %v4145_v41 = vld [vmem:[#allocation5] sm:$0xff]  ;;  %s3911_s25 = smov 64   ;;  %s3912_s17 = smov 16   ;;  %vm1337_vm7 = vcmask 523264   ;;  %vm3916_vm10 = vmmov 0  }
  0x60   :  { %3368 = vmatpush3.bf16.msra.mxu0 %v4068_v3  ;;  %vm2733_vm11 = vcmask 1040384   ;;  %s3918_s1 = smov [#allocation12]  }
  0x61   :  { %3370 = vmatprep.subr.bf16.mxu0 %v4075_v6  ;;  %s2911_s22 = sshll.u32 %s3918_s1, 4  ;;  %s2912_s22 = int_to_ptr.vmem [resolvable:$true] %s2911_s22 }
  0x62   :  { %s3846_s3 = scalar_lea.vmem %s2912_s22, 2048  ;;  %p3851_p13 = scmp.lt.s32.totalorder %s2912_s22, %s2912_s22 }
  0x63   :  { %p3847_p12 = scmp.ne.s32.totalorder %s2912_s22, %s3846_s3  ;;  %p3852_p0 = scmp.lt.s32.totalorder %s3846_s3, %s3846_s3 }
  0x64   :  { %3372 = vmatpush3.bf16.msra.mxu0 %v4075_v6 }
  0x65   :  { %p3853_p1 = por %p3852_p0, %p3851_p13 }
  0x67   :  { %3136 = vmatmul.mubr.msk.f32.vlgmr.msra.gmra.mrb[0].mxu0 %vm167_vm0, %v4083_v7  ;;  %p3854_p2 = pnand %p3853_p1, %p3847_p12 }
 0x13a   :  { %v3137_v9 = vpop.f32.mrb[0].mxu0 }
 0x13b   :  { %v246_v10 = vadd.f32 %v3137_v9, %v4087_v8  ;;  %v240_v11 = vpop.f32.mrb[1].mxu0 }
 0x13c   :  { %v241_v12 = vadd.f32 %v4087_v8, %v240_v11 }
 0x13d   :  { %257 = vrot.lane.b32.xlu1 %v246_v10, %s3907_s2 }
 0x13e   :  { %251 = vrot.lane.b32.xlu0 %v241_v12, %s3908_s13  ;;  %3142 = vmatprep.mubr.msk.f32.mxu1 %vm267_vm1, %v241_v12  ;;  %v4098_v13 = vpack.i.bf16 %v246_v10, %v241_v12 }
 0x141   :  { %255 = vrot.lane.b32.xlu1 %v241_v12, %s3907_s2 }
 0x142   :  { %253 = vrot.lane.b32.xlu0 %v246_v10, %s3908_s13 }
 0x145   :  { %261 = vrot.lane.b32.xlu1 %v246_v10, %s3909_s21 }
 0x146   :  { %259 = vrot.lane.b32.xlu0 %v241_v12, %s3909_s21 }
 0x14a   :  { %3558 = vrot.lane.b32.xlu0 %v4098_v13, %s3910_s23 }
 0x1af   :  { %v258_v14 = vpop.permute.xlu1 %257 }
 0x1b0   :  { %v252_v15 = vpop.permute.xlu0 %251 }
 0x1b1   :  { %3149 = vmatprep.mubr.msk.f32.mxu0 %vm267_vm1, %v252_v15 }
 0x1b3   :  { %v256_v16 = vpop.permute.xlu1 %255 }
 0x1b4   :  { %v4103_v17 = vpack.i.bf16 %v258_v14, %v256_v16  ;;  %v254_v18 = vpop.permute.xlu0 %253 }
 0x1b5   :  { %v4105_v19 = vpack.i.bf16 %v254_v18, %v252_v15 }
 0x1b6   :  { %3568 = vrot.lane.b32.xlu0 %v4103_v17, %s3910_s23 }
 0x1b7   :  { %v262_v20 = vpop.permute.xlu1 %261  ;;  %3563 = vrot.lane.b32.xlu1 %v4105_v19, %s3910_s23 }
 0x1b8   :  { %v260_v21 = vpop.permute.xlu0 %259 }
 0x1b9   :  { %v4111_v22 = vpack.i.bf16 %v262_v20, %v260_v21 }
 0x1bb   :  { %3573 = vrot.lane.b32.xlu1 %v4111_v22, %s3910_s23 }
 0x1bc   :  { %v3559_v23 = vpop.permute.xlu0 %3558 }
 0x1bd   :  { %v3561_v24 = vunpack.i.h.bf16 %v3559_v23  ;;  %v3560_v25 = vunpack.i.l.bf16 %v3559_v23 }
 0x1bf   :  { %v3373_v27 = vpack.c.bf16 %v3561_v24, %v3560_v25 }
 0x1c1   :  { %3375 = vmatprep.subr.msk.bf16.mxu1 %vm4117_vm2, %v3373_v27 }
 0x1c2   :  { %3378 = vmatpush3.bf16.xpose.msk.msra.mxu1 %vm4117_vm2, %v3373_v27 }
 0x1c9   :  { %3143 = vmatmul.mubr.msk.f32.vlgmr.msra.gmra.mrb[0].mxu1 %vm267_vm1, %v246_v10 }
 0x1ca   :  { %3156 = vmatprep.mubr.msk.f32.mxu1 %vm267_vm1, %v256_v16 }
 0x228   :  { %v3569_v28 = vpop.permute.xlu0 %3568 }
 0x229   :  { %v3571_v29 = vunpack.i.h.bf16 %v3569_v28  ;;  %v3570_v30 = vunpack.i.l.bf16 %v3569_v28  ;;  %v3564_v31 = vpop.permute.xlu1 %3563 }
 0x22a   :  { %v3566_v32 = vunpack.i.h.bf16 %v3564_v31  ;;  %v3565_v33 = vunpack.i.l.bf16 %v3564_v31 }
 0x22b   :  { %v3385_v34 = vpack.c.bf16 %v3571_v29, %v3570_v30 }
 0x22c   :  { %v3379_v35 = vpack.c.bf16 %v3566_v32, %v3565_v33 }
 0x22d   :  { %v3574_v36 = vpop.permute.xlu1 %3573  ;;  %3387 = vmatprep.subr.msk.bf16.mxu1 %vm4117_vm2, %v3385_v34 }
 0x22e   :  { %v3576_v37 = vunpack.i.h.bf16 %v3574_v36  ;;  %v3575_v38 = vunpack.i.l.bf16 %v3574_v36  ;;  %3381 = vmatprep.subr.msk.bf16.mxu0 %vm4117_vm2, %v3379_v35  ;;  %3390 = vmatpush3.bf16.xpose.msk.msra.mxu1 %vm4117_vm2, %v3385_v34 }
 0x22f   :  { %3384 = vmatpush3.bf16.xpose.msk.msra.mxu0 %vm4117_vm2, %v3379_v35 }
 0x230   :  { %v3391_v39 = vpack.c.bf16 %v3576_v37, %v3575_v38 }
 0x232   :  { %3393 = vmatprep.subr.msk.bf16.mxu0 %vm4117_vm2, %v3391_v39 }
 0x235   :  { %3157 = vmatmul.mubr.msk.f32.vlgmr.msra.gmra.mrb[2].mxu1 %vm267_vm1, %v258_v14 }
 0x236   :  { %3150 = vmatmul.mubr.msk.f32.vlgmr.msra.gmra.mrb[2].mxu0 %vm267_vm1, %v254_v18 }
 0x237   :  { %3396 = vmatpush3.bf16.xpose.msk.msra.mxu0 %vm4117_vm2, %v3391_v39  ;;  %3163 = vmatprep.mubr.msk.f32.mxu0 %vm267_vm1, %v260_v21 }
 0x23e   :  { %3164 = vmatmul.mubr.msk.f32.vlgmr.msra.gmra.mrb[4].mxu0 %vm267_vm1, %v262_v20 }
 0x29c   :  { %v3144_v42 = vpop.f32.mrb[0].mxu1 }
 0x29d   :  { %v348_v43 = vadd.f32 %v3144_v42, %v4143_v40  ;;  %v342_v44 = vpop.f32.mrb[1].mxu1 }
 0x29e   :  { %v343_v45 = vadd.f32 %v342_v44, %v4145_v41 }
 0x29f   :  { %v616_v46 = vsel %vm612_vm3, %v348_v43, -inf }
 0x2a0   :  { %617 = vmax.xlane.f32.xlu1 %v616_v46  ;;  %v613_v47 = vsel %vm612_vm3, %v343_v45, -inf }
 0x2a1   :  { %614 = vmax.xlane.f32.xlu0 %v613_v47 }
 0x308   :  { %v3158_v48 = vpop.f32.mrb[2].mxu1 }
 0x309   :  { %v3151_v49 = vpop.f32.mrb[2].mxu0  ;;  %v516_v50 = vpop.f32.mrb[3].mxu1  ;;  %v522_v57 = vadd.f32 %v3158_v48, %v4143_v40 }
 0x30a   :  { %v435_v51 = vadd.f32 %v3151_v49, %v4143_v40  ;;  %v517_v52 = vadd.f32 %v516_v50, %v4145_v41  ;;  %v429_v53 = vpop.f32.mrb[3].mxu0 }
 0x30b   :  { %v430_v54 = vadd.f32 %v429_v53, %v4145_v41  ;;  %v628_v63 = vsel %vm612_vm3, %v522_v57, -inf }
 0x30c   :  { %v625_v55 = vsel %vm612_vm3, %v517_v52, -inf  ;;  %v622_v56 = vsel %vm612_vm3, %v435_v51, -inf }
 0x30d   :  { %626 = vmax.xlane.f32.xlu1 %v625_v55  ;;  %623 = vmax.xlane.f32.xlu0 %v622_v56  ;;  %v619_v58 = vsel %vm612_vm3, %v430_v54, -inf }
 0x311   :  { %v3165_v59 = vpop.f32.mrb[4].mxu0  ;;  %620 = vmax.xlane.f32.xlu0 %v619_v58 }
 0x312   :  { %v603_v60 = vpop.f32.mrb[5].mxu0  ;;  %v609_v62 = vadd.f32 %v3165_v59, %v4143_v40 }
 0x313   :  { %v4159_v61 = vadd.f32 %v603_v60, %v4145_v41 }
 0x314   :  { %v634_v1 = vsel %vm612_vm3, %v609_v62, -inf }
 0x315   :  { %629 = vmax.xlane.f32.xlu0 %v628_v63  ;;  %v631_v0 = vsel %vm612_vm3, %v4159_v61, -inf }
 0x316   :  { %632 = vmax.xlane.f32.xlu1 %v631_v0 }
 0x319   :  { %635 = vmax.xlane.f32.xlu0 %v634_v1 }
 0x327   :  { %3578 = vrot.lane.b32.xlu1 %v4098_v13, %s3911_s25 }
 0x32d   :  { %v618_v2 = vpop.xlane.xlu1 %617 }
 0x32e   :  { %v638_v4 = vsub.f32 %v348_v43, %v618_v2  ;;  %v615_v10 = vpop.xlane.xlu0 %614 }
 0x32f   :  { %v637_v11 = vsub.f32 %v343_v45, %v615_v10 }
 0x330   :  { %v647_v9 = vmul.f32 1.442695, %v638_v4 }
 0x331   :  { %v645_v12 = vmul.f32 1.442695, %v637_v11 }
 0x332   :  { %3637 = vpow2.f32 %v647_v9 }
 0x333   :  { %3639 = vpow2.f32 %v645_v12 }
 0x33c   :  { %v3638_v14 = vpop.eup %3637 }
 0x33d   :  { %v664_v15 = vsel %vm612_vm3, %v3638_v14, 0.0  ;;  %v3640_v16 = vpop.eup %3639 }
 0x33e   :  { %665 = vadd.xlane.f32.xlu0 %v664_v15  ;;  %v661_v18 = vsel %vm612_vm3, %v3640_v16, 0.0 }
 0x34b   :  { %662 = vadd.xlane.f32.xlu1 %v661_v18 }
 0x39a   :  { %v627_v20 = vpop.xlane.xlu1 %626  ;;  %v624_v21 = vpop.xlane.xlu0 %623 }
 0x39b   :  { %v640_v23 = vsub.f32 %v435_v51, %v624_v21  ;;  %v641_v13 = vsub.f32 %v517_v52, %v627_v20 }
 0x39d   :  { %v651_v24 = vmul.f32 1.442695, %v640_v23  ;;  %v653_v28 = vmul.f32 1.442695, %v641_v13 }
 0x39e   :  { %v621_v25 = vpop.xlane.xlu0 %620 }
 0x39f   :  { %v639_v27 = vsub.f32 %v430_v54, %v621_v25  ;;  %3641 = vpow2.f32 %v651_v24 }
 0x3a1   :  { %v649_v29 = vmul.f32 1.442695, %v639_v27 }
 0x3a2   :  { %v630_v30 = vpop.xlane.xlu0 %629 }
 0x3a3   :  { %3643 = vpow2.f32 %v649_v29  ;;  %v642_v31 = vsub.f32 %v522_v57, %v630_v30  ;;  %v633_v32 = vpop.xlane.xlu1 %632 }
 0x3a4   :  { %3645 = vpow2.f32 %v653_v28  ;;  %v643_v54 = vsub.f32 %v4159_v61, %v633_v32 }
 0x3a5   :  { %v655_v33 = vmul.f32 1.442695, %v642_v31 }
 0x3a6   :  { %v636_v34 = vpop.xlane.xlu0 %635  ;;  %v657_v56 = vmul.f32 1.442695, %v643_v54 }
 0x3a7   :  { %3647 = vpow2.f32 %v655_v33  ;;  %v644_v35 = vsub.f32 %v609_v62, %v636_v34  ;;  %v3579_v36 = vpop.permute.xlu1 %3578 }
 0x3a8   :  { %v3581_v37 = vunpack.i.h.bf16 %v3579_v36  ;;  %v3580_v38 = vunpack.i.l.bf16 %v3579_v36 }
 0x3a9   :  { %v659_v39 = vmul.f32 1.442695, %v644_v35  ;;  %v3642_v42 = vpop.eup %3641 }
 0x3aa   :  { %v3397_v43 = vpack.c.bf16 %v3581_v37, %v3580_v38  ;;  %v670_v44 = vsel %vm612_vm3, %v3642_v42, 0.0  ;;  %v108_v37 = vld [vmem:[%s4609_s4] sm:$0xff]  ;;  %v109_v38 = vld [vmem:[%s4609_s4 + $0x8] sm:$0xff] }
 0x3ab   :  { %3649 = vpow2.f32 %v659_v39  ;;  %671 = vadd.xlane.f32.xlu0 %v670_v44  ;;  %v110_v39 = vld [vmem:[%s4609_s4 + $0x10] sm:$0xff] }
 0x3ac   :  { %3398 = vmatprep.subr.bf16.mxu1 %v3397_v43 }
 0x3ad   :  { %v3644_v45 = vpop.eup %3643  ;;  %3400 = vmatpush3.bf16.msra.mxu1 %v3397_v43  ;;  %v111_v43 = vld [vmem:[%s4609_s4 + $0x18] sm:$0xff]  ;;  %s3913_s4 = smov 24  }
 0x3ae   :  { %v667_v46 = vsel %vm612_vm3, %v3644_v45, 0.0  ;;  %v3646_v47 = vpop.eup %3645  ;;  %v4213_v44 = vpack.c.bf16 %v111_v43, %v110_v39 }
 0x3af   :  { %668 = vadd.xlane.f32.xlu1 %v667_v46  ;;  %v673_v49 = vsel %vm612_vm3, %v3646_v47, 0.0 }
 0x3b1   :  { %v3648_v48 = vpop.eup %3647 }
 0x3b2   :  { %v676_v50 = vsel %vm612_vm3, %v3648_v48, 0.0 }
 0x3b3   :  { %674 = vadd.xlane.f32.xlu1 %v673_v49  ;;  %677 = vadd.xlane.f32.xlu0 %v676_v50 }
 0x3b5   :  { %v3650_v51 = vpop.eup %3649 }
 0x3b6   :  { %v682_v52 = vsel %vm612_vm3, %v3650_v51, 0.0 }
 0x3b7   :  { %683 = vadd.xlane.f32.xlu0 %v682_v52 }
 0x3c4   :  { %3588 = vrot.lane.b32.xlu1 %v4103_v17, %s3911_s25 }
 0x3cb   :  { %v666_v53 = vpop.xlane.xlu0 %665 }
 0x3cc   :  { %3651 = vrcp.f32 %v666_v53 }
 0x3cd   :  { %3583 = vrot.lane.b32.xlu0 %v4105_v19, %s3911_s25 }
 0x3d6   :  { %v3652_v55 = vpop.eup %3651 }
 0x3d7   :  { %v694_v57 = vmul.f32 %v3652_v55, %v3638_v14 }
 0x3d8   :  { %v663_v58 = vpop.xlane.xlu1 %662 }
 0x3d9   :  { %702 = vst.msk [vmem:[#allocation12 + $0x8] sm:$0xff] %vm612_vm3, %v694_v57  ;;  %3653 = vrcp.f32 %v663_v58 }
 0x3da   :  { %3655 = vpow2.f32 %v657_v56 }
 0x3e3   :  { %v3654_v59 = vpop.eup %3653 }
 0x3e4   :  { %v3656_v60 = vpop.eup %3655  ;;  %v693_v62 = vmul.f32 %v3654_v59, %v3640_v16 }
 0x3e5   :  { %v679_v17 = vsel %vm612_vm3, %v3656_v60, 0.0 }
 0x3e6   :  { %701 = vst.msk [vmem:[#allocation12] sm:$0xff] %vm612_vm3, %v693_v62  ;;  %3170 = vmatprep.mubr.msk.f32.mxu1 %vm612_vm3, %v693_v62 }
 0x3e7   :  { %3171 = vmatmul.mubr.msk.f32.vlgmr.msra.gmra.mrb[4].mxu1 %vm612_vm3, %v694_v57 }
 0x3e8   :  { %680 = vadd.xlane.f32.xlu1 %v679_v17 }
 0x3f9   :  { %3593 = vrot.lane.b32.xlu1 %v4111_v22, %s3911_s25 }
 0x438   :  { %v672_v19 = vpop.xlane.xlu0 %671 }
 0x439   :  { %3657 = vrcp.f32 %v672_v19  ;;  %v139_v19 = vlaneseq }
 0x43c   :  { %v669_v61 = vpop.xlane.xlu1 %668 }
 0x43d   :  { %3659 = vrcp.f32 %v669_v61  ;;  %v4233_v61 = vshrl.u32 %v139_v19, 7 }
 0x43f   :  { %v149_v39 = vsub.s32 2, %v4233_v61 }
 0x440   :  { %v675_v63 = vpop.xlane.xlu1 %674  ;;  %v678_v0 = vpop.xlane.xlu0 %677 }
 0x441   :  { %3661 = vrcp.f32 %v675_v63  ;;  %v141_v63 = vsub.s32 0, %v4233_v61 }
 0x442   :  { %3663 = vrcp.f32 %v678_v0  ;;  %v4236_v0 = vld [vmem:[#allocation10] sm:$0xff] }
 0x443   :  { %v3658_v1 = vpop.eup %3657 }
 0x444   :  { %v3589_v2 = vpop.permute.xlu1 %3588  ;;  %v684_v4 = vpop.xlane.xlu0 %683  ;;  %v696_v9 = vmul.f32 %v3658_v1, %v3642_v42  ;;  %v4208_v42 = vpack.c.bf16 %v109_v38, %v108_v37  ;;  %v4239_v1 = vrot.slane %v4236_v0, %v141_v63  ;;  %v145_v38 = vsub.s32 1, %v4233_v61  ;;  %v4333_v63 = vld [vmem:[#allocation8] ss:$0 sm:$0xff] }
 0x445   :  { %v3591_v10 = vunpack.i.h.bf16 %v3589_v2  ;;  %v3590_v11 = vunpack.i.l.bf16 %v3589_v2  ;;  %3665 = vrcp.f32 %v684_v4 }
 0x446   :  { %704 = vst.msk [vmem:[#allocation12 + $0x18] sm:$0xff] %vm612_vm3, %v696_v9  ;;  %v4273_v43 = vrot.slane %v4236_v0, %v145_v38 }
 0x447   :  { %v3660_v12 = vpop.eup %3659  ;;  %v3405_v14 = vpack.c.bf16 %v3591_v10, %v3590_v11 }
 0x448   :  { %v3584_v22 = vpop.permute.xlu0 %3583  ;;  %v695_v15 = vmul.f32 %v3660_v12, %v3644_v45 }
 0x449   :  { %v3586_v16 = vunpack.i.h.bf16 %v3584_v22  ;;  %v3585_v18 = vunpack.i.l.bf16 %v3584_v22  ;;  %3406 = vmatprep.subr.bf16.mxu0 %v3405_v14 }
 0x44a   :  { %703 = vst.msk [vmem:[#allocation12 + $0x10] sm:$0xff] %vm612_vm3, %v695_v15  ;;  %3177 = vmatprep.mubr.msk.f32.mxu1 %vm612_vm3, %v695_v15  ;;  %3408 = vmatpush3.bf16.msra.mxu0 %v3405_v14 }
 0x44b   :  { %v3662_v20 = vpop.eup %3661  ;;  %v3401_v21 = vpack.c.bf16 %v3586_v16, %v3585_v18  ;;  %3414 = vmatprep.subr.bf16.mxu0 %v4208_v42 }
 0x44c   :  { %v3664_v23 = vpop.eup %3663  ;;  %v697_v13 = vmul.f32 %v3662_v20, %v3646_v47 }
 0x44d   :  { %v698_v24 = vmul.f32 %v3664_v23, %v3648_v48  ;;  %3402 = vmatprep.subr.bf16.mxu1 %v3401_v21 }
 0x44e   :  { %3404 = vmatpush3.bf16.msra.mxu1 %v3401_v21  ;;  %705 = vst.msk [vmem:[#allocation12 + $0x20] sm:$0xff] %vm612_vm3, %v697_v13  ;;  %3184 = vmatprep.mubr.msk.f32.mxu0 %vm612_vm3, %v697_v13 }
 0x44f   :  { %v3666_v25 = vpop.eup %3665  ;;  %706 = vst.msk [vmem:[#allocation12 + $0x28] sm:$0xff] %vm612_vm3, %v698_v24  ;;  %3185 = vmatmul.mubr.msk.f32.vlgmr.msra.gmra.mrb[6].mxu0 %vm612_vm3, %v698_v24 }
 0x450   :  { %v700_v27 = vmul.f32 %v3666_v25, %v3650_v51  ;;  %3416 = vmatpush3.bf16.msra.mxu0 %v4208_v42 }
 0x451   :  { %3178 = vmatmul.mubr.msk.f32.vlgmr.msra.gmra.mrb[6].mxu1 %vm612_vm3, %v696_v9  ;;  %3418 = vmatprep.subr.bf16.mxu0 %v4213_v44 }
 0x452   :  { %708 = vst.msk [vmem:[#allocation12 + $0x38] sm:$0xff] %vm612_vm3, %v700_v27 }
 0x454   :  { %3420 = vmatpush3.bf16.msra.mxu0 %v4213_v44 }
 0x475   :  { %v681_v28 = vpop.xlane.xlu1 %680 }
 0x476   :  { %3667 = vrcp.f32 %v681_v28 }
 0x479   :  { %v3594_v29 = vpop.permute.xlu1 %3593 }
 0x47a   :  { %v3596_v30 = vunpack.i.h.bf16 %v3594_v29  ;;  %v3595_v31 = vunpack.i.l.bf16 %v3594_v29  ;;  %v114_v29 = vld [vmem:[%s4610_s5 + $0x10] sm:$0xff] }
 0x47c   :  { %v3409_v32 = vpack.c.bf16 %v3596_v30, %v3595_v31  ;;  %v115_v30 = vld [vmem:[%s4610_s5 + $0x18] sm:$0xff] }
 0x47d   :  { %v4265_v31 = vpack.c.bf16 %v115_v30, %v114_v29 }
 0x47e   :  { %3410 = vmatprep.subr.bf16.mxu1 %v3409_v32 }
 0x47f   :  { %3412 = vmatpush3.bf16.msra.mxu1 %v3409_v32 }
 0x480   :  { %v3668_v33 = vpop.eup %3667 }
 0x481   :  { %v699_v34 = vmul.f32 %v3668_v33, %v3656_v60 }
 0x483   :  { %707 = vst.msk [vmem:[#allocation12 + $0x30] sm:$0xff] %vm612_vm3, %v699_v34  ;;  %3191 = vmatprep.mubr.msk.f32.mxu1 %vm612_vm3, %v699_v34 }
 0x484   :  { %3192 = vmatmul.mubr.msk.f32.vlgmr.msra.gmra.mrb[8].mxu1 %vm612_vm3, %v700_v27  ;;  %v113_v27 = vld [vmem:[%s4610_s5 + $0x8] sm:$0xff] }
 0x4ba   :  { %v3172_v35 = vpop.f32.mrb[4].mxu1 }
 0x4bb   :  { %v787_v36 = vpop.f32.mrb[5].mxu1 }
 0x522   :  { %v3186_v45 = vpop.f32.mrb[6].mxu0 }
 0x523   :  { %v961_v46 = vpop.f32.mrb[7].mxu0 }
 0x524   :  { %v3179_v47 = vpop.f32.mrb[6].mxu1 }
 0x525   :  { %1061 = vrot.lane.b32.xlu1 %v3179_v47, %s3903_s16  ;;  %v874_v48 = vpop.f32.mrb[7].mxu1 }
 0x526   :  { %1059 = vrot.lane.b32.xlu0 %v874_v48, %s3903_s16 }
 0x529   :  { %1069 = vrot.lane.b32.xlu1 %v3186_v45, %s3912_s17 }
 0x52a   :  { %1067 = vrot.lane.b32.xlu0 %v961_v46, %s3912_s17  ;;  %v4276_v46 = vrot.slane %v4236_v0, %v149_v39 }
 0x557   :  { %v3193_v49 = vpop.f32.mrb[8].mxu1 }
 0x558   :  { %1077 = vrot.lane.b32.xlu1 %v3193_v49, %s3913_s4  ;;  %v1048_v50 = vpop.f32.mrb[9].mxu1 }
 0x559   :  { %1075 = vrot.lane.b32.xlu0 %v1048_v50, %s3913_s4 }
 0x597   :  { %v1062_v51 = vpop.permute.xlu1 %1061 }
 0x598   :  { %v1060_v52 = vpop.permute.xlu0 %1059  ;;  %v1082_v57 = vsel %vm267_vm1, %v3172_v35, %v1062_v51 }
 0x599   :  { %v1081_v55 = vsel %vm267_vm1, %v787_v36, %v1060_v52 }
 0x59b   :  { %v1070_v53 = vpop.permute.xlu1 %1069 }
 0x59c   :  { %v1068_v54 = vpop.permute.xlu0 %1067  ;;  %v1084_v60 = vsel %vm612_vm3, %v1082_v57, %v1070_v53 }
 0x59d   :  { %v1083_v58 = vsel %vm612_vm3, %v1081_v55, %v1068_v54  ;;  %v116_v54 = vld [vmem:[%s4612_s7] sm:$0xff]  ;;  %v117_v55 = vld [vmem:[%s4612_s7 + $0x8] sm:$0xff] }
 0x5ca   :  { %v1078_v56 = vpop.permute.xlu1 %1077 }
 0x5cb   :  { %v1076_v59 = vpop.permute.xlu0 %1075  ;;  %v1087_v17 = vsel %vm1085_vm4, %v1084_v60, %v1078_v56  ;;  %v4299_v56 = vpack.c.bf16 %v117_v55, %v116_v54 }
 0x5cc   :  { %v1086_v62 = vsel %vm1085_vm4, %v1083_v58, %v1076_v59  ;;  %v120_v58 = vld [vmem:[%s4612_s7 + $0x20] sm:$0xff]  ;;  %v121_v59 = vld [vmem:[%s4612_s7 + $0x28] sm:$0xff] }
 0x5cd   :  { %3202 = vmatprep.mubr.msk.f32.mxu0 %vm167_vm0, %v1086_v62  ;;  %3430 = vmatprep.subr.bf16.mxu0 %v4299_v56  ;;  %v4319_v60 = vpack.c.bf16 %v121_v59, %v120_v58  ;;  %v122_v62 = vld [vmem:[%s4612_s7 + $0x30] sm:$0xff] }
 0x5ce   :  { %3203 = vmatmul.mubr.msk.f32.vlgmr.msra.gmra.mrb[8].mxu0 %vm167_vm0, %v1087_v17  ;;  %v123_v17 = vld [vmem:[%s4612_s7 + $0x38] sm:$0xff] }
 0x5cf   :  { %3432 = vmatpush3.bf16.msra.mxu0 %v4299_v56  ;;  %v4329_v19 = vpack.c.bf16 %v123_v17, %v122_v62  ;;  %v3914_v17 = vmov 1.0  }
 0x6a1   :  { %v3204_v2 = vpop.f32.mrb[8].mxu0 }
 0x6a2   :  { %v1166_v4 = vadd.f32 %v3204_v2, %v4239_v1  ;;  %v1160_v9 = vpop.f32.mrb[9].mxu0 }
 0x6a3   :  { %v1161_v10 = vadd.f32 %v1160_v9, %v4239_v1 }
 0x6a4   :  { %v1170_v11 = vadd.f32 %v1166_v4, %v4083_v7 }
 0x6a5   :  { %v1169_v12 = vadd.f32 %v1161_v10, %v4073_v5  ;;  %v112_v5 = vld [vmem:[%s4610_s5] sm:$0xff] }
 0x6a6   :  { %v1174_v14 = vsel %vm167_vm0, %v1170_v11, 0.0  ;;  %v4255_v28 = vpack.c.bf16 %v113_v27, %v112_v5 }
 0x6a7   :  { %1175 = vadd.xlane.f32.xlu1 %v1174_v14  ;;  %v1171_v22 = vsel %vm167_vm0, %v1169_v12, 0.0 }
 0x6a8   :  { %1172 = vadd.xlane.f32.xlu0 %v1171_v22  ;;  %3422 = vmatprep.subr.bf16.mxu1 %v4255_v28 }
 0x6a9   :  { %3424 = vmatpush3.bf16.msra.mxu1 %v4255_v28 }
 0x6aa   :  { %3426 = vmatprep.subr.bf16.mxu1 %v4265_v31 }
 0x6ad   :  { %3428 = vmatpush3.bf16.msra.mxu1 %v4265_v31 }
 0x6ae   :  { %3446 = vmatprep.subr.bf16.mxu1 %v4068_v3 }
 0x734   :  { %v1176_v15 = vpop.xlane.xlu1 %1175 }
 0x735   :  { %v1179_v16 = vmul.f32 0.03125, %v1176_v15  ;;  %v1173_v18 = vpop.xlane.xlu0 %1172 }
 0x736   :  { %v1178_v20 = vmul.f32 0.03125, %v1173_v18 }
 0x737   :  { %v1181_v21 = vsub.f32 %v1170_v11, %v1179_v16 }
 0x738   :  { %v1180_v23 = vsub.f32 %v1169_v12, %v1178_v20 }
 0x739   :  { %v1183_v25 = vmul.f32 %v1181_v21, %v1181_v21 }
 0x73a   :  { %v1182_v13 = vmul.f32 %v1180_v23, %v1180_v23 }
 0x73b   :  { %v1187_v7 = vsel %vm167_vm0, %v1183_v25, 0.0 }
 0x73c   :  { %v1184_v24 = vsel %vm167_vm0, %v1182_v13, 0.0 }
 0x73d   :  { %1185 = vadd.xlane.f32.xlu0 %v1184_v24 }
 0x741   :  { %1188 = vadd.xlane.f32.xlu0 %v1187_v7 }
 0x7ca   :  { %v1186_v32 = vpop.xlane.xlu0 %1185 }
 0x7cb   :  { %v1190_v33 = vmul.f32 0.03125, %v1186_v32 }
 0x7cd   :  { %v1192_v34 = vadd.f32 1e-12, %v1190_v33 }
 0x7ce   :  { %v1189_v35 = vpop.xlane.xlu0 %1188 }
 0x7cf   :  { %3669 = vrsqrt.f32 %v1192_v34  ;;  %v1191_v36 = vmul.f32 0.03125, %v1189_v35 }
 0x7d1   :  { %v1193_v37 = vadd.f32 1e-12, %v1191_v36 }
 0x7d3   :  { %3671 = vrsqrt.f32 %v1193_v37 }
 0x7d9   :  { %v3670_v45 = vpop.eup %3669 }
 0x7da   :  { %v1196_v47 = vmul.f32 %v3670_v45, %v1180_v23 }
 0x7dc   :  { %v1198_v48 = vmul.f32 %v1196_v47, %v4273_v43 }
 0x7dd   :  { %v3672_v49 = vpop.eup %3671 }
 0x7de   :  { %v1197_v50 = vmul.f32 %v3672_v49, %v1181_v21  ;;  %v4280_v51 = vadd.f32 %v1198_v48, %v4276_v46 }
 0x7e0   :  { %3213 = vmatprep.mubr.msk.f32.mxu1 %vm167_vm0, %v4280_v51  ;;  %v1199_v52 = vmul.f32 %v1197_v50, %v4273_v43 }
 0x7e2   :  { %v4286_v53 = vadd.f32 %v1199_v52, %v4276_v46 }
 0x7e4   :  { %3214 = vmatmul.mubr.msk.f32.vlgmr.msra.gmra.mrb[10].mxu1 %vm167_vm0, %v4286_v53 }
 0x7e5   :  { %3448 = vmatpush3.bf16.msra.mxu1 %v4068_v3  ;;  %v118_v3 = vld [vmem:[%s4612_s7 + $0x10] sm:$0xff] }
 0x7e6   :  { %3450 = vmatprep.subr.bf16.mxu1 %v4075_v6 }
 0x7e9   :  { %3452 = vmatpush3.bf16.msra.mxu1 %v4075_v6  ;;  %v119_v6 = vld [vmem:[%s4612_s7 + $0x18] sm:$0xff] }
 0x7ea   :  { %v4309_v57 = vpack.c.bf16 %v119_v6, %v118_v3 }
 0x7ec   :  { %3434 = vmatprep.subr.bf16.mxu0 %v4309_v57 }
 0x7ed   :  { %3436 = vmatpush3.bf16.msra.mxu0 %v4309_v57 }
 0x7ee   :  { %3438 = vmatprep.subr.bf16.mxu0 %v4319_v60 }
 0x7f1   :  { %3440 = vmatpush3.bf16.msra.mxu0 %v4319_v60 }
 0x7f2   :  { %3442 = vmatprep.subr.bf16.mxu0 %v4329_v19 }
 0x7f5   :  { %3444 = vmatpush3.bf16.msra.mxu0 %v4329_v19 }
 0x8b7   :  { %v3215_v2 = vpop.f32.mrb[10].mxu1 }
 0x8b8   :  { %v1280_v4 = vadd.f32 %v3215_v2, %v4333_v63  ;;  %v1274_v9 = vpop.f32.mrb[11].mxu1 }
 0x8b9   :  { %v1275_v10 = vadd.f32 %v4333_v63, %v1274_v9 }
 0x8ba   :  { %v1286_v11 = vmul.f32 0.70710677, %v1280_v4 }
 0x8bb   :  { %v1285_v12 = vmul.f32 0.70710677, %v1275_v10 }
 0x8bc   :  { %v1292_v14 = vand.u32 2147483647, %v1286_v11  ;;  %vm1288_vm5 = vcmp.lt.f32.partialorder %v1286_v11, 0.0  ;;  %v153_v11 = vsub.s32 3, %v4233_v61 }
 0x8bd   :  { %v1291_v22 = vand.u32 2147483647, %v1285_v12  ;;  %vm1287_vm6 = vcmp.lt.f32.partialorder %v1285_v12, 0.0  ;;  %v1290_v2 = vsel %vm1288_vm5, -1.0, %v3914_v17 }
 0x8be   :  { %v1294_v15 = vmul.f32 0.3275911, %v1292_v14  ;;  %v1320_v21 = vsub.f32 0.0, %v1292_v14  ;;  %v4343_v12 = vrot.slane %v4236_v0, %v153_v11 }
 0x8bf   :  { %v1293_v16 = vmul.f32 0.3275911, %v1291_v22  ;;  %v1319_v23 = vsub.f32 0.0, %v1291_v22 }
 0x8c0   :  { %v1296_v18 = vadd.f32 1.0, %v1294_v15  ;;  %v1322_v24 = vmul.f32 %v1320_v21, %v1292_v14  ;;  %v1284_v21 = vmul.f32 0.5, %v1280_v4 }
 0x8c1   :  { %v1295_v20 = vadd.f32 1.0, %v1293_v16  ;;  %v1321_v5 = vmul.f32 %v1319_v23, %v1291_v22  ;;  %v1289_v22 = vsel %vm1287_vm6, -1.0, %v3914_v17 }
 0x8c2   :  { %3673 = vrcp.f32 %v1296_v18  ;;  %v1325_v30 = vmul.f32 1.442695, %v1322_v24  ;;  %v1283_v18 = vmul.f32 0.5, %v1275_v10 }
 0x8c3   :  { %3675 = vrcp.f32 %v1295_v20  ;;  %v1323_v34 = vmul.f32 1.442695, %v1321_v5 }
 0x8c4   :  { %3677 = vpow2.f32 %v1325_v30 }
 0x8c5   :  { %3679 = vpow2.f32 %v1323_v34 }
 0x8cc   :  { %v3674_v13 = vpop.eup %3673 }
 0x8cd   :  { %v3676_v25 = vpop.eup %3675  ;;  %v1302_v7 = vmul.f32 1.0614054, %v3674_v13 }
 0x8ce   :  { %v1301_v27 = vmul.f32 1.0614054, %v3676_v25  ;;  %v3678_v55 = vpop.eup %3677 }
 0x8cf   :  { %v1304_v29 = vadd.f32 -1.4531521, %v1302_v7  ;;  %v3680_v6 = vpop.eup %3679 }
 0x8d0   :  { %v1303_v32 = vadd.f32 -1.4531521, %v1301_v27 }
 0x8d1   :  { %v1306_v33 = vmul.f32 %v3674_v13, %v1304_v29 }
 0x8d2   :  { %v1305_v35 = vmul.f32 %v3676_v25, %v1303_v32 }
 0x8d3   :  { %v1308_v36 = vadd.f32 1.4214138, %v1306_v33 }
 0x8d4   :  { %v1307_v37 = vadd.f32 1.4214138, %v1305_v35 }
 0x8d5   :  { %v1310_v38 = vmul.f32 %v3674_v13, %v1308_v36 }
 0x8d6   :  { %v1309_v39 = vmul.f32 %v3676_v25, %v1307_v37 }
 0x8d7   :  { %v1312_v45 = vadd.f32 -0.28449672, %v1310_v38 }
 0x8d8   :  { %v1311_v47 = vadd.f32 -0.28449672, %v1309_v39 }
 0x8d9   :  { %v1314_v48 = vmul.f32 %v3674_v13, %v1312_v45 }
 0x8da   :  { %v1313_v49 = vmul.f32 %v3676_v25, %v1311_v47 }
 0x8db   :  { %v1316_v50 = vadd.f32 0.2548296, %v1314_v48 }
 0x8dc   :  { %v1315_v52 = vadd.f32 0.2548296, %v1313_v49 }
 0x8dd   :  { %v1318_v54 = vmul.f32 %v3674_v13, %v1316_v50 }
 0x8de   :  { %v1317_v3 = vmul.f32 %v3676_v25, %v1315_v52  ;;  %v157_v52 = vsub.s32 4, %v4233_v61 }
 0x8df   :  { %v1328_v58 = vmul.f32 %v3678_v55, %v1318_v54  ;;  %v161_v54 = vsub.s32 5, %v4233_v61 }
 0x8e0   :  { %v1327_v59 = vmul.f32 %v3680_v6, %v1317_v3  ;;  %v4356_v55 = vrot.slane %v4236_v0, %v157_v52 }
 0x8e1   :  { %v1330_v62 = vsub.f32 1.0, %v1328_v58 }
 0x8e2   :  { %v1329_v9 = vsub.f32 1.0, %v1327_v59  ;;  %v4359_v59 = vrot.slane %v4236_v0, %v161_v54 }
 0x8e3   :  { %v1332_v14 = vmul.f32 %v1330_v62, %v1290_v2 }
 0x8e4   :  { %v1331_v15 = vmul.f32 %v1329_v9, %v1289_v22 }
 0x8e5   :  { %v1334_v16 = vadd.f32 1.0, %v1332_v14 }
 0x8e6   :  { %v1333_v20 = vadd.f32 1.0, %v1331_v15 }
 0x8e7   :  { %v1336_v13 = vmul.f32 %v1334_v16, %v1284_v21 }
 0x8e8   :  { %v1335_v23 = vmul.f32 %v1333_v20, %v1283_v18 }
 0x8ea   :  { %3232 = vmatprep.mubr.msk.f32.mxu0 %vm1337_vm7, %v1335_v23 }
 0x8eb   :  { %3233 = vmatmul.mubr.msk.f32.vlgmr.msra.gmra.mrb[10].mxu0 %vm1337_vm7, %v1336_v13 }
 0x9be   :  { %v3234_v24 = vpop.f32.mrb[10].mxu0 }
 0x9bf   :  { %v1416_v25 = vadd.f32 %v3234_v24, %v4343_v12  ;;  %v1410_v7 = vpop.f32.mrb[11].mxu0 }
 0x9c0   :  { %v1411_v10 = vadd.f32 %v1410_v7, %v4343_v12 }
 0x9c1   :  { %v1420_v4 = vadd.f32 %v1416_v25, %v4286_v53 }
 0x9c2   :  { %v1419_v5 = vadd.f32 %v1411_v10, %v4280_v51 }
 0x9c3   :  { %v1424_v27 = vsel %vm167_vm0, %v1420_v4, 0.0 }
 0x9c4   :  { %1425 = vadd.xlane.f32.xlu0 %v1424_v27  ;;  %v1421_v29 = vsel %vm167_vm0, %v1419_v5, 0.0 }
 0x9c5   :  { %1422 = vadd.xlane.f32.xlu1 %v1421_v29 }
 0xa51   :  { %v1426_v30 = vpop.xlane.xlu0 %1425 }
 0xa52   :  { %v1428_v32 = vmul.f32 0.03125, %v1426_v30  ;;  %v1423_v33 = vpop.xlane.xlu1 %1422 }
 0xa53   :  { %v1427_v34 = vmul.f32 0.03125, %v1423_v33 }
 0xa54   :  { %v1430_v35 = vsub.f32 %v1420_v4, %v1428_v32 }
 0xa55   :  { %v1429_v36 = vsub.f32 %v1419_v5, %v1427_v34 }
 0xa56   :  { %v1432_v37 = vmul.f32 %v1430_v35, %v1430_v35 }
 0xa57   :  { %v1431_v38 = vmul.f32 %v1429_v36, %v1429_v36 }
 0xa58   :  { %v1436_v39 = vsel %vm167_vm0, %v1432_v37, 0.0 }
 0xa59   :  { %1437 = vadd.xlane.f32.xlu0 %v1436_v39  ;;  %v1433_v53 = vsel %vm167_vm0, %v1431_v38, 0.0 }
 0xa5a   :  { %1434 = vadd.xlane.f32.xlu1 %v1433_v53 }
 0xae6   :  { %v1438_v51 = vpop.xlane.xlu0 %1437 }
 0xae7   :  { %v1440_v45 = vmul.f32 0.03125, %v1438_v51  ;;  %v1435_v47 = vpop.xlane.xlu1 %1434 }
 0xae8   :  { %v1439_v48 = vmul.f32 0.03125, %v1435_v47 }
 0xae9   :  { %v1442_v49 = vadd.f32 1e-12, %v1440_v45 }
 0xaea   :  { %v1441_v50 = vadd.f32 1e-12, %v1439_v48 }
 0xaeb   :  { %3681 = vrsqrt.f32 %v1442_v49 }
 0xaec   :  { %3683 = vrsqrt.f32 %v1441_v50 }
 0xaf5   :  { %v3682_v3 = vpop.eup %3681 }
 0xaf6   :  { %v3684_v6 = vpop.eup %3683  ;;  %v1446_v58 = vmul.f32 %v3682_v3, %v1430_v35 }
 0xaf7   :  { %v1445_v62 = vmul.f32 %v3684_v6, %v1429_v36 }
 0xaf8   :  { %v1448_v2 = vmul.f32 %v1446_v58, %v4356_v55 }
 0xaf9   :  { %v1447_v9 = vmul.f32 %v1445_v62, %v4356_v55 }
 0xafa   :  { %v4367_v22 = vadd.f32 %v1448_v2, %v4359_v59 }
 0xafb   :  { %v4364_v14 = vadd.f32 %v1447_v9, %v4359_v59 }
 0xafd   :  { %3243 = vmatprep.mubr.msk.f32.mxu1 %vm167_vm0, %v4364_v14 }
 0xafe   :  { %3244 = vmatmul.mubr.msk.f32.vlgmr.msra.gmra.mrb[12].mxu1 %vm167_vm0, %v4367_v22 }
 0xbd1   :  { %v3245_v15 = vpop.f32.mrb[12].mxu1 }
 0xbd2   :  { %v1529_v0 = vadd.f32 %v3245_v15, %v4087_v8  ;;  %v1523_v16 = vpop.f32.mrb[13].mxu1 }
 0xbd3   :  { %v1524_v18 = vadd.f32 %v4087_v8, %v1523_v16 }
 0xbd4   :  { %1540 = vrot.lane.b32.xlu1 %v1529_v0, %s3907_s2  ;;  %1536 = vrot.lane.b32.xlu0 %v1529_v0, %s3908_s13 }
 0xbd5   :  { %3250 = vmatprep.mubr.msk.f32.mxu1 %vm267_vm1, %v1524_v18  ;;  %v4380_v20 = vpack.i.bf16 %v1529_v0, %v1524_v18 }
 0xbd8   :  { %1542 = vrot.lane.b32.xlu0 %v1524_v18, %s3909_s21  ;;  %1534 = vrot.lane.b32.xlu1 %v1524_v18, %s3908_s13 }
 0xbdc   :  { %3598 = vrot.lane.b32.xlu0 %v4380_v20, %s3910_s23  ;;  %1538 = vrot.lane.b32.xlu1 %v1524_v18, %s3907_s2 }
 0xbe0   :  { %1544 = vrot.lane.b32.xlu1 %v1529_v0, %s3909_s21 }
 0xc46   :  { %v1541_v8 = vpop.permute.xlu1 %1540  ;;  %v1537_v21 = vpop.permute.xlu0 %1536 }
 0xc4a   :  { %v1543_v23 = vpop.permute.xlu0 %1542  ;;  %v1535_v13 = vpop.permute.xlu1 %1534 }
 0xc4b   :  { %v4386_v11 = vpack.i.bf16 %v1537_v21, %v1535_v13  ;;  %3257 = vmatprep.mubr.msk.f32.mxu0 %vm267_vm1, %v1535_v13 }
 0xc4d   :  { %3603 = vrot.lane.b32.xlu1 %v4386_v11, %s3910_s23 }
 0xc4e   :  { %v3599_v24 = vpop.permute.xlu0 %3598  ;;  %v1539_v25 = vpop.permute.xlu1 %1538 }
 0xc4f   :  { %v3601_v7 = vunpack.i.h.bf16 %v3599_v24  ;;  %v3600_v10 = vunpack.i.l.bf16 %v3599_v24  ;;  %v4391_v4 = vpack.i.bf16 %v1541_v8, %v1539_v25 }
 0xc51   :  { %v3453_v5 = vpack.c.bf16 %v3601_v7, %v3600_v10  ;;  %3608 = vrot.lane.b32.xlu0 %v4391_v4, %s3910_s23 }
 0xc52   :  { %v1545_v27 = vpop.permute.xlu1 %1544 }
 0xc53   :  { %v4395_v29 = vpack.i.bf16 %v1545_v27, %v1543_v23  ;;  %3455 = vmatprep.subr.msk.bf16.mxu1 %vm4117_vm2, %v3453_v5 }
 0xc54   :  { %3458 = vmatpush3.bf16.xpose.msk.msra.mxu1 %vm4117_vm2, %v3453_v5 }
 0xc55   :  { %3613 = vrot.lane.b32.xlu1 %v4395_v29, %s3910_s23 }
 0xc5b   :  { %3251 = vmatmul.mubr.msk.f32.vlgmr.msra.gmra.mrb[14].mxu1 %vm267_vm1, %v1529_v0 }
 0xc5c   :  { %3264 = vmatprep.mubr.msk.f32.mxu1 %vm267_vm1, %v1539_v25 }
 0xcbf   :  { %v3604_v30 = vpop.permute.xlu1 %3603 }
 0xcc0   :  { %v3606_v32 = vunpack.i.h.bf16 %v3604_v30  ;;  %v3605_v33 = vunpack.i.l.bf16 %v3604_v30 }
 0xcc2   :  { %v3459_v34 = vpack.c.bf16 %v3606_v32, %v3605_v33 }
 0xcc3   :  { %v3609_v35 = vpop.permute.xlu0 %3608 }
 0xcc4   :  { %v3611_v36 = vunpack.i.h.bf16 %v3609_v35  ;;  %v3610_v37 = vunpack.i.l.bf16 %v3609_v35  ;;  %3461 = vmatprep.subr.msk.bf16.mxu0 %vm4117_vm2, %v3459_v34 }
 0xcc5   :  { %3464 = vmatpush3.bf16.xpose.msk.msra.mxu0 %vm4117_vm2, %v3459_v34 }
 0xcc6   :  { %v3465_v38 = vpack.c.bf16 %v3611_v36, %v3610_v37 }
 0xcc7   :  { %v3614_v39 = vpop.permute.xlu1 %3613 }
 0xcc8   :  { %v3616_v53 = vunpack.i.h.bf16 %v3614_v39  ;;  %v3615_v51 = vunpack.i.l.bf16 %v3614_v39  ;;  %3467 = vmatprep.subr.msk.bf16.mxu1 %vm4117_vm2, %v3465_v38 }
 0xcc9   :  { %3470 = vmatpush3.bf16.xpose.msk.msra.mxu1 %vm4117_vm2, %v3465_v38 }
 0xcca   :  { %v3471_v45 = vpack.c.bf16 %v3616_v53, %v3615_v51 }
 0xccc   :  { %3258 = vmatmul.mubr.msk.f32.vlgmr.msra.gmra.mrb[12].mxu0 %vm267_vm1, %v1537_v21  ;;  %3473 = vmatprep.subr.msk.bf16.mxu0 %vm4117_vm2, %v3471_v45 }
 0xccd   :  { %3476 = vmatpush3.bf16.xpose.msk.msra.mxu0 %vm4117_vm2, %v3471_v45  ;;  %3271 = vmatprep.mubr.msk.f32.mxu0 %vm267_vm1, %v1543_v23 }
 0xcd0   :  { %3265 = vmatmul.mubr.msk.f32.vlgmr.msra.gmra.mrb[16].mxu1 %vm267_vm1, %v1541_v8 }
 0xcd4   :  { %3272 = vmatmul.mubr.msk.f32.vlgmr.msra.gmra.mrb[14].mxu0 %vm267_vm1, %v1545_v27 }
 0xd2e   :  { %v3252_v47 = vpop.f32.mrb[14].mxu1 }
 0xd2f   :  { %v1630_v48 = vadd.f32 %v3252_v47, %v4143_v40  ;;  %v1624_v49 = vpop.f32.mrb[15].mxu1 }
 0xd30   :  { %v1625_v50 = vadd.f32 %v1624_v49, %v4145_v41 }
 0xd31   :  { %v1897_v52 = vsel %vm612_vm3, %v1630_v48, -inf }
 0xd32   :  { %1898 = vmax.xlane.f32.xlu1 %v1897_v52  ;;  %v1894_v54 = vsel %vm612_vm3, %v1625_v50, -inf }
 0xd33   :  { %1895 = vmax.xlane.f32.xlu0 %v1894_v54 }
 0xd9f   :  { %v3259_v26 = vpop.f32.mrb[12].mxu0 }
 0xda0   :  { %v1717_v3 = vadd.f32 %v3259_v26, %v4143_v40  ;;  %v1711_v6 = vpop.f32.mrb[13].mxu0 }
 0xda1   :  { %v1712_v58 = vadd.f32 %v1711_v6, %v4145_v41 }
 0xda2   :  { %v1903_v62 = vsel %vm612_vm3, %v1717_v3, -inf }
 0xda3   :  { %v3266_v2 = vpop.f32.mrb[16].mxu1  ;;  %1904 = vmax.xlane.f32.xlu0 %v1903_v62  ;;  %v1900_v16 = vsel %vm612_vm3, %v1712_v58, -inf }
 0xda4   :  { %v1798_v9 = vpop.f32.mrb[17].mxu1  ;;  %v1804_v0 = vadd.f32 %v3266_v2, %v4143_v40 }
 0xda5   :  { %v1799_v15 = vadd.f32 %v1798_v9, %v4145_v41 }
 0xda6   :  { %v1909_v24 = vsel %vm612_vm3, %v1804_v0, -inf }
 0xda7   :  { %v3273_v18 = vpop.f32.mrb[14].mxu0  ;;  %1901 = vmax.xlane.f32.xlu0 %v1900_v16  ;;  %v1906_v8 = vsel %vm612_vm3, %v1799_v15, -inf }
 0xda8   :  { %v1885_v21 = vpop.f32.mrb[15].mxu0  ;;  %1907 = vmax.xlane.f32.xlu1 %v1906_v8  ;;  %v1891_v13 = vadd.f32 %v3273_v18, %v4143_v40 }
 0xda9   :  { %v4433_v23 = vadd.f32 %v1885_v21, %v4145_v41 }
 0xdaa   :  { %v1915_v7 = vsel %vm612_vm3, %v1891_v13, -inf }
 0xdab   :  { %1910 = vmax.xlane.f32.xlu0 %v1909_v24  ;;  %v1912_v25 = vsel %vm612_vm3, %v4433_v23, -inf }
 0xdac   :  { %1913 = vmax.xlane.f32.xlu1 %v1912_v25 }
 0xdaf   :  { %1916 = vmax.xlane.f32.xlu0 %v1915_v7 }
 0xdbd   :  { %3618 = vrot.lane.b32.xlu1 %v4380_v20, %s3911_s25 }
 0xdbf   :  { %v1899_v10 = vpop.xlane.xlu1 %1898 }
 0xdc0   :  { %v1919_v5 = vsub.f32 %v1630_v48, %v1899_v10  ;;  %v1896_v41 = vpop.xlane.xlu0 %1895 }
 0xdc1   :  { %v1918_v30 = vsub.f32 %v1625_v50, %v1896_v41 }
 0xdc2   :  { %v1928_v27 = vmul.f32 1.442695, %v1919_v5 }
 0xdc3   :  { %v1926_v32 = vmul.f32 1.442695, %v1918_v30 }
 0xdc4   :  { %3685 = vpow2.f32 %v1928_v27 }
 0xdc5   :  { %3687 = vpow2.f32 %v1926_v32 }
 0xdce   :  { %v3686_v40 = vpop.eup %3685 }
 0xdcf   :  { %v1945_v33 = vsel %vm612_vm3, %v3686_v40, 0.0  ;;  %v3688_v34 = vpop.eup %3687 }
 0xdd0   :  { %1946 = vadd.xlane.f32.xlu0 %v1945_v33  ;;  %v1942_v35 = vsel %vm612_vm3, %v3688_v34, 0.0 }
 0xde1   :  { %1943 = vadd.xlane.f32.xlu1 %v1942_v35 }
 0xe30   :  { %v1905_v36 = vpop.xlane.xlu0 %1904 }
 0xe31   :  { %v1921_v37 = vsub.f32 %v1717_v3, %v1905_v36 }
 0xe33   :  { %v1932_v38 = vmul.f32 1.442695, %v1921_v37 }
 0xe34   :  { %v1902_v20 = vpop.xlane.xlu0 %1901 }
 0xe35   :  { %3689 = vpow2.f32 %v1932_v38  ;;  %v1920_v39 = vsub.f32 %v1712_v58, %v1902_v20  ;;  %v1908_v53 = vpop.xlane.xlu1 %1907 }
 0xe36   :  { %v1922_v51 = vsub.f32 %v1799_v15, %v1908_v53 }
 0xe37   :  { %v1930_v45 = vmul.f32 1.442695, %v1920_v39 }
 0xe38   :  { %v1934_v47 = vmul.f32 1.442695, %v1922_v51  ;;  %v1911_v48 = vpop.xlane.xlu0 %1910 }
 0xe39   :  { %3691 = vpow2.f32 %v1930_v45  ;;  %v1923_v49 = vsub.f32 %v1804_v0, %v1911_v48  ;;  %v1914_v50 = vpop.xlane.xlu1 %1913 }
 0xe3a   :  { %3693 = vpow2.f32 %v1934_v47  ;;  %v1924_v5 = vsub.f32 %v4433_v23, %v1914_v50 }
 0xe3b   :  { %v1936_v52 = vmul.f32 1.442695, %v1923_v49 }
 0xe3c   :  { %v1917_v54 = vpop.xlane.xlu0 %1916  ;;  %v1938_v41 = vmul.f32 1.442695, %v1924_v5 }
 0xe3d   :  { %3695 = vpow2.f32 %v1936_v52  ;;  %v1925_v26 = vsub.f32 %v1891_v13, %v1917_v54  ;;  %v3619_v6 = vpop.permute.xlu1 %3618 }
 0xe3e   :  { %v3621_v62 = vunpack.i.h.bf16 %v3619_v6  ;;  %v3620_v3 = vunpack.i.l.bf16 %v3619_v6 }
 0xe3f   :  { %v3690_v2 = vpop.eup %3689  ;;  %v1940_v9 = vmul.f32 1.442695, %v1925_v26 }
 0xe40   :  { %v3477_v16 = vpack.c.bf16 %v3621_v62, %v3620_v3  ;;  %v1951_v58 = vsel %vm612_vm3, %v3690_v2, 0.0 }
 0xe41   :  { %3697 = vpow2.f32 %v1940_v9  ;;  %1952 = vadd.xlane.f32.xlu0 %v1951_v58 }
 0xe42   :  { %3478 = vmatprep.subr.bf16.mxu1 %v3477_v16 }
 0xe43   :  { %v3692_v15 = vpop.eup %3691  ;;  %3480 = vmatpush3.bf16.msra.mxu1 %v3477_v16 }
 0xe44   :  { %v1948_v0 = vsel %vm612_vm3, %v3692_v15, 0.0  ;;  %v3694_v18 = vpop.eup %3693 }
 0xe45   :  { %1949 = vadd.xlane.f32.xlu1 %v1948_v0  ;;  %v1954_v21 = vsel %vm612_vm3, %v3694_v18, 0.0 }
 0xe47   :  { %v3696_v8 = vpop.eup %3695 }
 0xe48   :  { %v1957_v13 = vsel %vm612_vm3, %v3696_v8, 0.0 }
 0xe49   :  { %1955 = vadd.xlane.f32.xlu1 %v1954_v21  ;;  %1958 = vadd.xlane.f32.xlu0 %v1957_v13 }
 0xe4b   :  { %v4448_v24 = vpop.eup %3697 }
 0xe4c   :  { %v1963_v25 = vsel %vm612_vm3, %v4448_v24, 0.0 }
 0xe4d   :  { %1964 = vadd.xlane.f32.xlu0 %v1963_v25 }
 0xe5a   :  { %3628 = vrot.lane.b32.xlu1 %v4391_v4, %s3911_s25 }
 0xe5d   :  { %v1947_v7 = vpop.xlane.xlu0 %1946 }
 0xe5e   :  { %3699 = vrcp.f32 %v1947_v7 }
 0xe63   :  { %3623 = vrot.lane.b32.xlu0 %v4386_v11, %s3911_s25 }
 0xe68   :  { %v3700_v10 = vpop.eup %3699 }
 0xe69   :  { %v1975_v27 = vmul.f32 %v3700_v10, %v3686_v40 }
 0xe6b   :  { %1984 = vst.msk [vmem:[#allocation12 + $0x48] sm:$0xff] %vm612_vm3, %v1975_v27 }
 0xe6e   :  { %v1944_v30 = vpop.xlane.xlu1 %1943 }
 0xe6f   :  { %3701 = vrcp.f32 %v1944_v30 }
 0xe70   :  { %3703 = vpow2.f32 %v1938_v41 }
 0xe79   :  { %v3702_v32 = vpop.eup %3701 }
 0xe7a   :  { %v4458_v33 = vpop.eup %3703  ;;  %v1974_v35 = vmul.f32 %v3702_v32, %v3688_v34 }
 0xe7b   :  { %v1960_v11 = vsel %vm612_vm3, %v4458_v33, 0.0 }
 0xe7c   :  { %1983 = vst.msk [vmem:[#allocation12 + $0x40] sm:$0xff] %vm612_vm3, %v1974_v35  ;;  %3278 = vmatprep.mubr.msk.f32.mxu1 %vm612_vm3, %v1974_v35 }
 0xe7d   :  { %3279 = vmatmul.mubr.msk.f32.vlgmr.msra.gmra.mrb[18].mxu1 %vm612_vm3, %v1975_v27 }
 0xe7e   :  { %1961 = vadd.xlane.f32.xlu1 %v1960_v11 }
 0xe8f   :  { %3633 = vrot.lane.b32.xlu1 %v4395_v29, %s3911_s25 }
 0xece   :  { %v1953_v4 = vpop.xlane.xlu0 %1952 }
 0xecf   :  { %3705 = vrcp.f32 %v1953_v4 }
 0xed2   :  { %v1950_v23 = vpop.xlane.xlu1 %1949 }
 0xed3   :  { %3707 = vrcp.f32 %v1950_v23 }
 0xed6   :  { %v1956_v40 = vpop.xlane.xlu1 %1955  ;;  %v1959_v36 = vpop.xlane.xlu0 %1958 }
 0xed7   :  { %3709 = vrcp.f32 %v1956_v40 }
 0xed8   :  { %3711 = vrcp.f32 %v1959_v36 }
 0xed9   :  { %v3706_v34 = vpop.eup %3705 }
 0xeda   :  { %v1977_v37 = vmul.f32 %v3706_v34, %v3690_v2  ;;  %v3629_v38 = vpop.permute.xlu1 %3628  ;;  %v1965_v20 = vpop.xlane.xlu0 %1964 }
 0xedb   :  { %v3631_v39 = vunpack.i.h.bf16 %v3629_v38  ;;  %v3630_v53 = vunpack.i.l.bf16 %v3629_v38  ;;  %3713 = vrcp.f32 %v1965_v20 }
 0xedc   :  { %1986 = vst.msk [vmem:[#allocation12 + $0x58] sm:$0xff] %vm612_vm3, %v1977_v37 }
 0xedd   :  { %v3708_v51 = vpop.eup %3707  ;;  %v3485_v45 = vpack.c.bf16 %v3631_v39, %v3630_v53 }
 0xede   :  { %v3624_v29 = vpop.permute.xlu0 %3623  ;;  %v1976_v47 = vmul.f32 %v3708_v51, %v3692_v15 }
 0xedf   :  { %v3626_v48 = vunpack.i.h.bf16 %v3624_v29  ;;  %v3625_v49 = vunpack.i.l.bf16 %v3624_v29  ;;  %3486 = vmatprep.subr.bf16.mxu0 %v3485_v45 }
 0xee0   :  { %1985 = vst.msk [vmem:[#allocation12 + $0x50] sm:$0xff] %vm612_vm3, %v1976_v47  ;;  %3285 = vmatprep.mubr.msk.f32.mxu1 %vm612_vm3, %v1976_v47  ;;  %3488 = vmatpush3.bf16.msra.mxu0 %v3485_v45 }
 0xee1   :  { %v3710_v50 = vpop.eup %3709  ;;  %v3481_v52 = vpack.c.bf16 %v3626_v48, %v3625_v49  ;;  %3494 = vmatprep.subr.bf16.mxu0 %v4208_v42 }
 0xee2   :  { %v3712_v54 = vpop.eup %3711  ;;  %v1978_v26 = vmul.f32 %v3710_v50, %v3694_v18 }
 0xee3   :  { %v1979_v6 = vmul.f32 %v3712_v54, %v3696_v8  ;;  %3482 = vmatprep.subr.bf16.mxu1 %v3481_v52 }
 0xee4   :  { %3484 = vmatpush3.bf16.msra.mxu1 %v3481_v52  ;;  %1987 = vst.msk [vmem:[#allocation12 + $0x60] sm:$0xff] %vm612_vm3, %v1978_v26  ;;  %3292 = vmatprep.mubr.msk.f32.mxu0 %vm612_vm3, %v1978_v26 }
 0xee5   :  { %v3714_v62 = vpop.eup %3713  ;;  %1988 = vst.msk [vmem:[#allocation12 + $0x68] sm:$0xff] %vm612_vm3, %v1979_v6  ;;  %3293 = vmatmul.mubr.msk.f32.vlgmr.msra.gmra.mrb[16].mxu0 %vm612_vm3, %v1979_v6 }
 0xee6   :  { %v1981_v3 = vmul.f32 %v3714_v62, %v4448_v24  ;;  %3496 = vmatpush3.bf16.msra.mxu0 %v4208_v42 }
 0xee7   :  { %3286 = vmatmul.mubr.msk.f32.vlgmr.msra.gmra.mrb[20].mxu1 %vm612_vm3, %v1977_v37  ;;  %3498 = vmatprep.subr.bf16.mxu0 %v4213_v44 }
 0xee8   :  { %1990 = vst.msk [vmem:[#allocation12 + $0x78] sm:$0xff] %vm612_vm3, %v1981_v3 }
 0xeea   :  { %3500 = vmatpush3.bf16.msra.mxu0 %v4213_v44 }
 0xeeb   :  { %3510 = vmatprep.subr.bf16.mxu0 %v4299_v56 }
 0xf0b   :  { %v1962_v2 = vpop.xlane.xlu1 %1961 }
 0xf0c   :  { %3715 = vrcp.f32 %v1962_v2 }
 0xf0f   :  { %v3634_v9 = vpop.permute.xlu1 %3633 }
 0xf10   :  { %v3636_v16 = vunpack.i.h.bf16 %v3634_v9  ;;  %v3635_v58 = vunpack.i.l.bf16 %v3634_v9 }
 0xf12   :  { %v3489_v15 = vpack.c.bf16 %v3636_v16, %v3635_v58 }
 0xf14   :  { %3490 = vmatprep.subr.bf16.mxu1 %v3489_v15 }
 0xf15   :  { %3492 = vmatpush3.bf16.msra.mxu1 %v3489_v15 }
 0xf16   :  { %v3716_v0 = vpop.eup %3715  ;;  %3502 = vmatprep.subr.bf16.mxu1 %v4255_v28 }
 0xf17   :  { %v1980_v42 = vmul.f32 %v3716_v0, %v4458_v33 }
 0xf19   :  { %1989 = vst.msk [vmem:[#allocation12 + $0x70] sm:$0xff] %vm612_vm3, %v1980_v42  ;;  %3299 = vmatprep.mubr.msk.f32.mxu1 %vm612_vm3, %v1980_v42 }
 0xf1a   :  { %3300 = vmatmul.mubr.msk.f32.vlgmr.msra.gmra.mrb[22].mxu1 %vm612_vm3, %v1981_v3 }
 0xf1b   :  { %3504 = vmatpush3.bf16.msra.mxu1 %v4255_v28 }
 0xf1c   :  { %3506 = vmatprep.subr.bf16.mxu1 %v4265_v31 }
 0xf1f   :  { %3508 = vmatpush3.bf16.msra.mxu1 %v4265_v31 }
 0xf50   :  { %v3280_v44 = vpop.f32.mrb[18].mxu1 }
 0xf51   :  { %v2069_v18 = vpop.f32.mrb[19].mxu1 }
 0xfb8   :  { %v3294_v8 = vpop.f32.mrb[16].mxu0 }
 0xfb9   :  { %v2243_v21 = vpop.f32.mrb[17].mxu0 }
 0xfba   :  { %v3287_v13 = vpop.f32.mrb[20].mxu1 }
 0xfbb   :  { %2343 = vrot.lane.b32.xlu1 %v3287_v13, %s3903_s16  ;;  %v2156_v24 = vpop.f32.mrb[21].mxu1 }
 0xfbc   :  { %2341 = vrot.lane.b32.xlu0 %v2156_v24, %s3903_s16 }
 0xfbf   :  { %2351 = vrot.lane.b32.xlu1 %v3294_v8, %s3912_s17 }
 0xfc0   :  { %2349 = vrot.lane.b32.xlu0 %v2243_v21, %s3912_s17 }
 0xfed   :  { %v3301_v25 = vpop.f32.mrb[22].mxu1 }
 0xfee   :  { %2359 = vrot.lane.b32.xlu1 %v3301_v25, %s3913_s4  ;;  %v2330_v28 = vpop.f32.mrb[23].mxu1 }
 0xfef   :  { %2357 = vrot.lane.b32.xlu0 %v2330_v28, %s3913_s4 }
0x102d   :  { %v2344_v31 = vpop.permute.xlu1 %2343 }
0x102e   :  { %v2342_v7 = vpop.permute.xlu0 %2341  ;;  %v2364_v30 = vsel %vm267_vm1, %v3280_v44, %v2344_v31 }
0x102f   :  { %v2363_v27 = vsel %vm267_vm1, %v2069_v18, %v2342_v7 }
0x1031   :  { %v2352_v10 = vpop.permute.xlu1 %2351 }
0x1032   :  { %v2350_v5 = vpop.permute.xlu0 %2349  ;;  %v2366_v35 = vsel %vm612_vm3, %v2364_v30, %v2352_v10 }
0x1033   :  { %v2365_v32 = vsel %vm612_vm3, %v2363_v27, %v2350_v5 }
0x1060   :  { %v2360_v41 = vpop.permute.xlu1 %2359 }
0x1061   :  { %v2358_v33 = vpop.permute.xlu0 %2357  ;;  %v2368_v4 = vsel %vm1085_vm4, %v2366_v35, %v2360_v41 }
0x1062   :  { %v2367_v11 = vsel %vm1085_vm4, %v2365_v32, %v2358_v33 }
0x1063   :  { %3310 = vmatprep.mubr.msk.f32.mxu0 %vm167_vm0, %v2367_v11 }
0x1064   :  { %3311 = vmatmul.mubr.msk.f32.vlgmr.msra.gmra.mrb[18].mxu0 %vm167_vm0, %v2368_v4 }
0x1065   :  { %3512 = vmatpush3.bf16.msra.mxu0 %v4299_v56 }
0x1066   :  { %3514 = vmatprep.subr.bf16.mxu0 %v4309_v57 }
0x1069   :  { %3516 = vmatpush3.bf16.msra.mxu0 %v4309_v57 }
0x106a   :  { %3518 = vmatprep.subr.bf16.mxu0 %v4319_v60 }
0x106d   :  { %3520 = vmatpush3.bf16.msra.mxu0 %v4319_v60 }
0x106e   :  { %3522 = vmatprep.subr.bf16.mxu0 %v4329_v19 }
0x1071   :  { %3524 = vmatpush3.bf16.msra.mxu0 %v4329_v19 }
0x1137   :  { %v3312_v23 = vpop.f32.mrb[18].mxu0 }
0x1138   :  { %v2447_v40 = vadd.f32 %v3312_v23, %v4239_v1  ;;  %v2441_v36 = vpop.f32.mrb[19].mxu0 }
0x1139   :  { %v2442_v34 = vadd.f32 %v2441_v36, %v4239_v1 }
0x113a   :  { %v2451_v56 = vadd.f32 %v2447_v40, %v4367_v22 }
0x113b   :  { %v2450_v37 = vadd.f32 %v2442_v34, %v4364_v14 }
0x113c   :  { %v2455_v57 = vsel %vm167_vm0, %v2451_v56, 0.0 }
0x113d   :  { %2456 = vadd.xlane.f32.xlu1 %v2455_v57  ;;  %v2452_v38 = vsel %vm167_vm0, %v2450_v37, 0.0 }
0x113e   :  { %2453 = vadd.xlane.f32.xlu0 %v2452_v38 }
0x11ca   :  { %v2457_v60 = vpop.xlane.xlu1 %2456 }
0x11cb   :  { %v2459_v20 = vmul.f32 0.03125, %v2457_v60  ;;  %v2454_v39 = vpop.xlane.xlu0 %2453 }
0x11cc   :  { %v2458_v19 = vmul.f32 0.03125, %v2454_v39 }
0x11cd   :  { %v2461_v53 = vsub.f32 %v2451_v56, %v2459_v20 }
0x11ce   :  { %v2460_v51 = vsub.f32 %v2450_v37, %v2458_v19 }
0x11cf   :  { %v2463_v1 = vmul.f32 %v2461_v53, %v2461_v53 }
0x11d0   :  { %v2462_v45 = vmul.f32 %v2460_v51, %v2460_v51 }
0x11d1   :  { %v2467_v22 = vsel %vm167_vm0, %v2463_v1, 0.0 }
0x11d2   :  { %v2464_v29 = vsel %vm167_vm0, %v2462_v45, 0.0 }
0x11d3   :  { %2465 = vadd.xlane.f32.xlu0 %v2464_v29 }
0x11d7   :  { %2468 = vadd.xlane.f32.xlu0 %v2467_v22 }
0x1260   :  { %v2466_v14 = vpop.xlane.xlu0 %2465 }
0x1261   :  { %v2470_v47 = vmul.f32 0.03125, %v2466_v14 }
0x1263   :  { %v2472_v48 = vadd.f32 1e-12, %v2470_v47 }
0x1264   :  { %v2469_v49 = vpop.xlane.xlu0 %2468 }
0x1265   :  { %3717 = vrsqrt.f32 %v2472_v48  ;;  %v2471_v50 = vmul.f32 0.03125, %v2469_v49 }
0x1267   :  { %v2473_v52 = vadd.f32 1e-12, %v2471_v50 }
0x1269   :  { %3719 = vrsqrt.f32 %v2473_v52 }
0x126f   :  { %v3718_v54 = vpop.eup %3717 }
0x1270   :  { %v2476_v26 = vmul.f32 %v3718_v54, %v2460_v51 }
0x1272   :  { %v2478_v6 = vmul.f32 %v2476_v26, %v4273_v43 }
0x1273   :  { %v3720_v62 = vpop.eup %3719 }
0x1274   :  { %v2477_v3 = vmul.f32 %v3720_v62, %v2461_v53  ;;  %v4521_v2 = vadd.f32 %v2478_v6, %v4276_v46 }
0x1276   :  { %3321 = vmatprep.mubr.msk.f32.mxu1 %vm167_vm0, %v4521_v2  ;;  %v2479_v9 = vmul.f32 %v2477_v3, %v4273_v43 }
0x1278   :  { %v4527_v16 = vadd.f32 %v2479_v9, %v4276_v46 }
0x127a   :  { %3322 = vmatmul.mubr.msk.f32.vlgmr.msra.gmra.mrb[24].mxu1 %vm167_vm0, %v4527_v16 }
0x134d   :  { %v3323_v58 = vpop.f32.mrb[24].mxu1 }
0x134e   :  { %v2560_v15 = vadd.f32 %v3323_v58, %v4333_v63  ;;  %v2554_v0 = vpop.f32.mrb[25].mxu1 }
0x134f   :  { %v2555_v42 = vadd.f32 %v4333_v63, %v2554_v0 }
0x1350   :  { %v2566_v44 = vmul.f32 0.70710677, %v2560_v15  ;;  %v2564_v54 = vmul.f32 0.5, %v2560_v15 }
0x1351   :  { %v2565_v18 = vmul.f32 0.70710677, %v2555_v42  ;;  %v2563_v50 = vmul.f32 0.5, %v2555_v42 }
0x1352   :  { %v2572_v8 = vand.u32 2147483647, %v2566_v44  ;;  %vm2568_vm8 = vcmp.lt.f32.partialorder %v2566_v44, 0.0 }
0x1353   :  { %v2571_v21 = vand.u32 2147483647, %v2565_v18  ;;  %vm2567_vm9 = vcmp.lt.f32.partialorder %v2565_v18, 0.0  ;;  %v2570_v1 = vsel %vm2568_vm8, -1.0, %v3914_v17 }
0x1354   :  { %v2574_v13 = vmul.f32 0.3275911, %v2572_v8  ;;  %v2600_v46 = vsub.f32 0.0, %v2572_v8  ;;  %v2569_v47 = vsel %vm2567_vm9, -1.0, %v3914_v17 }
0x1355   :  { %v2573_v24 = vmul.f32 0.3275911, %v2571_v21  ;;  %v2599_v28 = vsub.f32 0.0, %v2571_v21 }
0x1356   :  { %v2576_v25 = vadd.f32 1.0, %v2574_v13  ;;  %v2602_v7 = vmul.f32 %v2600_v46, %v2572_v8  ;;  %v2736_v46 = vld [vmem:[%s4614_s9 + $0x8] sm:$0xff] }
0x1357   :  { %v2575_v43 = vadd.f32 1.0, %v2573_v24  ;;  %v2601_v27 = vmul.f32 %v2599_v28, %v2571_v21 }
0x1358   :  { %3721 = vrcp.f32 %v2576_v25  ;;  %v2605_v63 = vmul.f32 1.442695, %v2602_v7  ;;  %v2738_v7 = vld [vmem:[%s4614_s9 + $0x18] sm:$0xff] }
0x1359   :  { %3723 = vrcp.f32 %v2575_v43  ;;  %v2603_v35 = vmul.f32 1.442695, %v2601_v27 }
0x135a   :  { %3725 = vpow2.f32 %v2605_v63 }
0x135b   :  { %3727 = vpow2.f32 %v2603_v35 }
0x1362   :  { %v3722_v31 = vpop.eup %3721 }
0x1363   :  { %v3724_v10 = vpop.eup %3723  ;;  %v2582_v5 = vmul.f32 1.0614054, %v3722_v31 }
0x1364   :  { %v2581_v41 = vmul.f32 1.0614054, %v3724_v10  ;;  %v3726_v39 = vpop.eup %3725 }
0x1365   :  { %v2584_v30 = vadd.f32 -1.4531521, %v2582_v5  ;;  %v3728_v53 = vpop.eup %3727  ;;  %v3917_v5 = vmov 0.0  }
0x1366   :  { %v2583_v32 = vadd.f32 -1.4531521, %v2581_v41  ;;  %3351 = vmatprep.mubr.msk.f32.mxu1 %vm3916_vm10, %v3917_v5 }
0x1367   :  { %v2586_v33 = vmul.f32 %v3722_v31, %v2584_v30 }
0x1368   :  { %v2585_v11 = vmul.f32 %v3724_v10, %v2583_v32 }
0x1369   :  { %v2588_v4 = vadd.f32 1.4214138, %v2586_v33 }
0x136a   :  { %v2587_v23 = vadd.f32 1.4214138, %v2585_v11 }
0x136b   :  { %v2590_v40 = vmul.f32 %v3722_v31, %v2588_v4 }
0x136c   :  { %v2589_v36 = vmul.f32 %v3724_v10, %v2587_v23 }
0x136d   :  { %v2592_v34 = vadd.f32 -0.28449672, %v2590_v40 }
0x136e   :  { %v2591_v56 = vadd.f32 -0.28449672, %v2589_v36 }
0x136f   :  { %v2594_v37 = vmul.f32 %v3722_v31, %v2592_v34 }
0x1370   :  { %v2593_v57 = vmul.f32 %v3724_v10, %v2591_v56 }
0x1371   :  { %v2596_v38 = vadd.f32 0.2548296, %v2594_v37 }
0x1372   :  { %v2595_v60 = vadd.f32 0.2548296, %v2593_v57 }
0x1373   :  { %v2598_v20 = vmul.f32 %v3722_v31, %v2596_v38  ;;  %v2737_v31 = vld [vmem:[%s4614_s9 + $0x10] sm:$0xff] }
0x1374   :  { %v2597_v19 = vmul.f32 %v3724_v10, %v2595_v60  ;;  %v3915_v10 = vmov 0.0|0.0   ;;  %v3529_v27 = vpack.c.bf16 %v2738_v7, %v2737_v31  ;;  %v2817_v60 = vld [vmem:[%s4615_s10] sm:$0xff] }
0x1375   :  { %v2608_v51 = vmul.f32 %v3726_v39, %v2598_v20  ;;  %3525 = vmatprep.subr.bf16.mxu1 %v3915_v10  ;;  %v2818_v20 = vld [vmem:[%s4615_s10 + $0x8] sm:$0xff]  ;;  %v2820_v39 = vld [vmem:[%s4615_s10 + $0x18] sm:$0xff] }
0x1376   :  { %v2607_v45 = vmul.f32 %v3728_v53, %v2597_v19  ;;  %v2741_v53 = vsub.s32 6, %v4233_v61 }
0x1377   :  { %v2610_v29 = vsub.f32 1.0, %v2608_v51  ;;  %v3735_v51 = vld [vmem:[#allocation10] sm:$0xff] }
0x1378   :  { %v2609_v22 = vsub.f32 1.0, %v2607_v45  ;;  %v2742_v45 = vrot.slane %v3735_v51, %v2741_v53 }
0x1379   :  { %v2612_v14 = vmul.f32 %v2610_v29, %v2570_v1 }
0x137a   :  { %v2611_v48 = vmul.f32 %v2609_v22, %v2569_v47 }
0x137b   :  { %v2614_v49 = vadd.f32 1.0, %v2612_v14 }
0x137c   :  { %v2613_v52 = vadd.f32 1.0, %v2611_v48 }
0x137d   :  { %v2616_v6 = vmul.f32 %v2614_v49, %v2564_v54 }
0x137e   :  { %v2615_v26 = vmul.f32 %v2613_v52, %v2563_v50 }
0x1380   :  { %3340 = vmatprep.mubr.msk.f32.mxu0 %vm1337_vm7, %v2615_v26 }
0x1381   :  { %3341 = vmatmul.mubr.msk.f32.vlgmr.msra.gmra.mrb[20].mxu0 %vm1337_vm7, %v2616_v6 }
0x1454   :  { %v3342_v62 = vpop.f32.mrb[20].mxu0 }
0x1455   :  { %v2695_v3 = vadd.f32 %v3342_v62, %v4343_v12  ;;  %v2689_v9 = vpop.f32.mrb[21].mxu0 }
0x1456   :  { %v2690_v58 = vadd.f32 %v2689_v9, %v4343_v12 }
0x1457   :  { %v2699_v0 = vadd.f32 %v2695_v3, %v4527_v16 }
0x1458   :  { %v2698_v17 = vadd.f32 %v2690_v58, %v4521_v2  ;;  %v2735_v2 = vld [vmem:[%s4614_s9] sm:$0xff] }
0x1459   :  { %v2703_v42 = vsel %vm167_vm0, %v2699_v0, 0.0  ;;  %v3526_v28 = vpack.c.bf16 %v2736_v46, %v2735_v2 }
0x145a   :  { %2704 = vadd.xlane.f32.xlu1 %v2703_v42  ;;  %v2700_v15 = vsel %vm167_vm0, %v2698_v17, 0.0 }
0x145b   :  { %2701 = vadd.xlane.f32.xlu0 %v2700_v15  ;;  %3527 = vmatpush3.bf16.msra.mxu1 %v3526_v28 }
0x145c   :  { %3528 = vmatprep.subr.bf16.mxu1 %v3915_v10 }
0x145f   :  { %3530 = vmatpush3.bf16.msra.mxu1 %v3529_v27 }
0x1460   :  { %3531 = vmatprep.subr.bf16.mxu1 %v3915_v10 }
0x14e7   :  { %v2705_v44 = vpop.xlane.xlu1 %2704 }
0x14e8   :  { %v2707_v18 = vmul.f32 0.03125, %v2705_v44  ;;  %v2702_v8 = vpop.xlane.xlu0 %2701 }
0x14e9   :  { %v2706_v21 = vmul.f32 0.03125, %v2702_v8 }
0x14ea   :  { %v2709_v13 = vsub.f32 %v2699_v0, %v2707_v18 }
0x14eb   :  { %v2708_v24 = vsub.f32 %v2698_v17, %v2706_v21 }
0x14ec   :  { %v2711_v25 = vmul.f32 %v2709_v13, %v2709_v13 }
0x14ed   :  { %v2710_v43 = vmul.f32 %v2708_v24, %v2708_v24 }
0x14ee   :  { %v2715_v12 = vsel %vm167_vm0, %v2711_v25, 0.0 }
0x14ef   :  { %2716 = vadd.xlane.f32.xlu1 %v2715_v12  ;;  %v2712_v16 = vsel %vm167_vm0, %v2710_v43, 0.0 }
0x14f0   :  { %2713 = vadd.xlane.f32.xlu0 %v2712_v16 }
0x157c   :  { %v2717_v41 = vpop.xlane.xlu1 %2716 }
0x157d   :  { %v2719_v30 = vmul.f32 0.03125, %v2717_v41  ;;  %v2714_v63 = vpop.xlane.xlu0 %2713 }
0x157e   :  { %v2718_v32 = vmul.f32 0.03125, %v2714_v63 }
0x157f   :  { %v2721_v33 = vadd.f32 1e-12, %v2719_v30 }
0x1580   :  { %v2720_v35 = vadd.f32 1e-12, %v2718_v32 }
0x1581   :  { %3729 = vrsqrt.f32 %v2721_v33 }
0x1582   :  { %3731 = vrsqrt.f32 %v2720_v35 }
0x158b   :  { %v3730_v11 = vpop.eup %3729 }
0x158c   :  { %v3732_v4 = vpop.eup %3731  ;;  %v2725_v23 = vmul.f32 %v3730_v11, %v2709_v13 }
0x158d   :  { %v2724_v40 = vmul.f32 %v3732_v4, %v2708_v24 }
0x158e   :  { %v2727_v36 = vmul.f32 %v2725_v23, %v4356_v55 }
0x158f   :  { %v2726_v34 = vmul.f32 %v2724_v40, %v4356_v55  ;;  %v2819_v55 = vld [vmem:[%s4615_s10 + $0x10] sm:$0xff] }
0x1590   :  { %v2729_v56 = vadd.f32 %v2727_v36, %v4359_v59  ;;  %v3535_v19 = vpack.c.bf16 %v2820_v39, %v2819_v55 }
0x1591   :  { %v2728_v37 = vadd.f32 %v2726_v34, %v4359_v59  ;;  %v3532_v59 = vpack.c.bf16 %v2818_v20, %v2817_v60 }
0x1592   :  { %v2731_v57 = vrot.slane %v2729_v56, 7 }
0x1594   :  { %v2734_v38 = vsel %vm2733_vm11, %v2728_v37, %v2731_v57 }
0x1595   :  { %3352 = vmatmul.mubr.msk.f32.vlgmr.msra.gmra.mrb[26].mxu1 %vm167_vm0, %v2734_v38 }
0x1596   :  { %3362 = vmatprep.mubr.msk.f32.mxu1 %vm3916_vm10, %v3917_v5  ;;  %3533 = vmatpush3.bf16.msra.mxu1 %v3532_v59 }
0x1597   :  { %3534 = vmatprep.subr.bf16.mxu1 %v3915_v10 }
0x159a   :  { %3536 = vmatpush3.bf16.msra.mxu1 %v3535_v19 }
0x1668   :  { %v2812_v29 = vpop.f32.mrb[26].mxu1 }
0x1669   :  { %v2813_v1 = vadd.f32 %v2812_v29, %v2742_v45  ;;  %v3353_v22 = vpop.f32.mrb[27].mxu1 }
0x166b   :  { %3733 = vtanh.f32 %v2813_v1 }
0x1675   :  { %v3734_v14 = vpop.eup %3733 }
0x1676   :  { %3363 = vmatmul.mubr.msk.f32.vlgmr.msra.gmra.mrb[28].mxu1 %vm167_vm0, %v3734_v14 }
0x1677   :  { %3857 = shalt.err (!%p3854_p2)
}
0x1678   :  { %s3858_s30 = scalar_lea.hbm %s4617_s12, 2048 }
0x1679   :  { %p3859_p3 = scmp.ne.s32.totalorder %s4617_s12, %s3858_s30  ;;  %p3862_p4 = scmp.lt.u32.totalorder %s3858_s30, %s4617_s12 }
0x167b   :  { %p3864_p5 = pnand %p3862_p4, %p3859_p3 }
0x167d   :  { %3867 = shalt.err (!%p3864_p5)
}
0x167e   :  { %2917 = dma.vmem_to_hbm [thread:$0]  %s2912_s22, 2048, %s4617_s12, [#allocation13], %s3902_s15, %s3902_s15, %s3903_s16   ;;  %vm2894_vm12 = vcmask 9216  }
0x167f   :  { %s3919_s2 = smov [#allocation11]  }
0x1680   :  { %s2902_s13 = sshll.u32 %s3919_s2, 4  ;;  %s2903_s13 = int_to_ptr.vmem [resolvable:$true] %s2902_s13 }
0x1681   :  { %s3868_s21 = scalar_lea.vmem %s2903_s13, 32  ;;  %p3873_p7 = scmp.lt.s32.totalorder %s2903_s13, %s2903_s13 }
0x1682   :  { %p3869_p6 = scmp.ne.s32.totalorder %s2903_s13, %s3868_s21  ;;  %p3874_p8 = scmp.lt.s32.totalorder %s3868_s21, %s3868_s21 }
0x1684   :  { %p3875_p9 = por %p3874_p8, %p3873_p7 }
0x1686   :  { %p3876_p10 = pnand %p3875_p9, %p3869_p6 }
0x1749   :  { %v2890_v61 = vpop.f32.mrb[28].mxu1 }
0x174a   :  { %v3364_v47 = vpop.f32.mrb[29].mxu1  ;;  %2895 = vst.msk [vmem:[#allocation11] sm:$0x3] %vm2894_vm12, %v2890_v61 }
0x174b   :  { %3879 = shalt.err (!%p3876_p10)
}
0x174c   :  { %s3880_s17 = scalar_lea.hbm %s4616_s11, 32 }
0x174d   :  { %p3881_p11 = scmp.ne.s32.totalorder %s4616_s11, %s3880_s17  ;;  %p3884_p12 = scmp.lt.u32.totalorder %s3880_s17, %s4616_s11 }
0x174f   :  { %p3886_p13 = pnand %p3884_p12, %p3881_p11 }
0x1751   :  { %3889 = shalt.err (!%p3886_p13)
}
0x1752   :  { %2905 = dma.vmem_to_hbm [thread:$0]  %s2903_s13, 32, %s4616_s11, [#allocation4]  }
0x1753   :  { %3896 = dma.done.wait [#allocation4], 32  }
0x1754   :  { %3897 = vsyncadd [#allocation4], 4294967264 }
0x1755   :  { %3898 = dma.done.wait [#allocation13], 2048  }
0x1756   :  { %3899 = vsyncadd [#allocation13], 4294965248 }
0x1757   :  { %2924 = vsyncpa [#allocation3], 1 }
0x1758   :  { %2925 = vsyncpa [#allocation6], 1 }
0x1759   :  { %2926 = vsyncpa [#allocation9], 1 }
0x175a   :  { %2927 = vsyncpa [#allocation4], 1 }
0x175b   :  { %2928 = vsyncpa [#allocation13], 1 }

</bundles_post_ra>
